<compile_context>
chip_gen: v6e
topology: v6e:2x2x1
jax: 0.10.0
libtpu: 0.0.40
codegen_flags: <defaults>
</compile_context>

<pallas_src>
import jax
import jax.numpy as jnp
from jax.experimental import pallas as pl
from jax.experimental.pallas import tpu as pltpu

_SUBLANE = 8  # f32 sublane quantum


# ----------------------------------------------------------------------------
# Fused kernel: all LSTM layers (gate order [i, f, o, g]) + fc/sigmoid head.
# ----------------------------------------------------------------------------
def _make_fused_kernel(no_layers, seq_len, batch_pad, embed_dim, hidden_dim, out_dim):
    L, T, Bp, E, H, O = no_layers, seq_len, batch_pad, embed_dim, hidden_dim, out_dim
    assert L >= 1, "need at least one LSTM layer"

    def kernel(*refs):
        x_ref = refs[0]                                   # (T*Bp, E) bf16, time-major
        layer_refs = refs[1:1 + 3 * L]                    # (w_ih, w_hh, bias) per layer
        h0_ref = refs[1 + 3 * L]                          # (L, Bp, H) f32
        c0_ref = refs[2 + 3 * L]                          # (L, Bp, H) f32
        fcw_ref = refs[3 + 3 * L]                         # (H, O) f32
        fcb_ref = refs[4 + 3 * L]                         # (1, O) f32
        sig_ref = refs[5 + 3 * L]                         # (Bp, O)  out
        hn_ref = refs[6 + 3 * L]                          # (L, Bp, H) out
        cn_ref = refs[7 + 3 * L]                          # (L, Bp, H) out

        # Read the (small) weights once; broadcasts hoisted out of the loops.
        w_ih = [layer_refs[3 * l][...] for l in range(L)]            # bf16
        w_hh = [layer_refs[3 * l + 1][...] for l in range(L)]        # bf16
        bias_raw = [layer_refs[3 * l + 2][...] for l in range(L)]    # (1, 4H) f32
        bias_b = [None] + [jnp.broadcast_to(bias_raw[l], (Bp, 4 * H))
                           for l in range(1, L)]                     # per-step layers

        # Layer-0 input projection hoisted over all T timesteps (x fully known):
        # one (T*Bp, E) @ (E, 4H) matmul instead of T tiny ones.
        gx0 = jnp.dot(x_ref[...], w_ih[0],
                      preferred_element_type=jnp.float32) + bias_raw[0]  # (T*Bp, 4H)

        h = [h0_ref[l] for l in range(L)]                 # f32 (Bp, H) each
        c = [c0_ref[l] for l in range(L)]
        x_next = [None] * L     # x_next[l] = layer (l-1) output feeding layer l next

        def cell(gates, hl, cl):
            # Gate layout [i | f | o | g]: one wide sigmoid + one tanh.
            s = jax.nn.sigmoid(gates[:, :3 * H])
            g = jnp.tanh(gates[:, 3 * H:])
            i_, f_, o_ = s[:, :H], s[:, H:2 * H], s[:, 2 * H:3 * H]
            cl = f_ * cl + i_ * g
            hl = o_ * jnp.tanh(cl)
            return hl, cl

        # Wavefront schedule over the (layer, time) nest.  Layers are visited
        # high->low inside a diagonal so x_next[l] is consumed before layer
        # l-1 overwrites it with the next timestep's output.
        for d in range(T + L - 1):
            for l in range(L - 1, -1, -1):
                t = d - l
                if not (0 <= t < T):
                    continue
                if l == 0:
                    gates = gx0[t * Bp:(t + 1) * Bp, :] + jnp.dot(
                        h[0].astype(jnp.bfloat16), w_hh[0],
                        preferred_element_type=jnp.float32)
                else:
                    gates = (jnp.dot(x_next[l], w_ih[l],
                                     preferred_element_type=jnp.float32)
                             + bias_b[l]
                             + jnp.dot(h[l].astype(jnp.bfloat16), w_hh[l],
                                       preferred_element_type=jnp.float32))
                h[l], c[l] = cell(gates, h[l], c[l])
                if l + 1 < L:
                    x_next[l + 1] = h[l].astype(jnp.bfloat16)

        for l in range(L):
            hn_ref[l] = h[l]
            cn_ref[l] = c[l]

        # fc + sigmoid head on the final hidden state of the last layer only:
        # PyTorch's sig_out.view(B,-1)[:, -1] consumes exactly this element.
        # TODO(synk): nn.Dropout(0.3) is identity here (eval/inference semantics).
        sig_ref[...] = jax.nn.sigmoid(
            jnp.dot(h[L - 1], fcw_ref[...], preferred_element_type=jnp.float32)
            + fcb_ref[...])

    return kernel


# ----------------------------------------------------------------------------
# pallas_call wrapper.
# ----------------------------------------------------------------------------
def _fused_call(x_flat, flat_w, h0, c0, fc_w, fc_b, seq_len):
    """x_flat: (T*Bp, E) bf16 time-major; flat_w: [w_ih, w_hh, bias] * L,
    gate-reordered, weights bf16.  Returns (sig (Bp,O), h_n, c_n) padded."""
    _, E = x_flat.shape
    L, Bp, H = h0.shape
    T = seq_len
    O = fc_w.shape[-1]

    n_in = 1 + len(flat_w) + 4
    vmem = pl.BlockSpec(memory_space=pltpu.MemorySpace.VMEM)

    # Explicit VMEM budget for the all-resident, no-grid design: inputs +
    # outputs + largest live intermediates (gx0 + per-layer values), with
    # headroom, clamped to stay within v7x's 64 MiB physical VMEM.
    footprint = (x_flat.size * 2
                 + sum(int(w.size) * w.dtype.itemsize for w in flat_w)
                 + 2 * h0.size * 4 + fc_w.size * 4 + fc_b.size * 4        # inputs
                 + (Bp * O + 2 * L * Bp * H) * 4                          # outputs
                 + T * Bp * 4 * H * 4 + T * Bp * H * 4)                   # live vals
    vmem_limit = int(min(48 * 1024 * 1024, max(16 * 1024 * 1024, 4 * footprint)))

    return pl.pallas_call(
        _make_fused_kernel(L, T, Bp, E, H, O),
        out_shape=(
            jax.ShapeDtypeStruct((Bp, O), jnp.float32),      # sigmoid(fc(h_T))
            jax.ShapeDtypeStruct((L, Bp, H), jnp.float32),   # h_n
            jax.ShapeDtypeStruct((L, Bp, H), jnp.float32),   # c_n
        ),
        in_specs=[vmem] * n_in,
        out_specs=(vmem, vmem, vmem),
        compiler_params=pltpu.CompilerParams(vmem_limit_bytes=vmem_limit),
    )(x_flat, *flat_w, h0, c0, fc_w, fc_b)


def _round_up(x, m):
    return (x + m - 1) // m * m


def _reorder_gates_ifog(w):
    """PyTorch LSTM gate order [i, f, g, o] -> [i, f, o, g] along the last axis."""
    H = w.shape[-1] // 4
    i, f, g, o = (w[..., k * H:(k + 1) * H] for k in range(4))
    return jnp.concatenate([i, f, o, g], axis=-1)


# ----------------------------------------------------------------------------
# Full forward pass of LSTMAnalyzer (inference semantics: dropout = identity).
# ----------------------------------------------------------------------------
def lstm_analyzer_forward(x_tokens, hidden, params):
    """x_tokens: (B, T) int32 token ids; hidden: (h0, c0) each (L, B, H)."""
    B, T = x_tokens.shape
    h0, c0 = hidden
    L, _, H = h0.shape
    E = params["embedding"].shape[-1]
    Bp = max(_SUBLANE, _round_up(B, _SUBLANE))   # pad batch to sublane quantum

    # Embedding gather (JAX glue) directly into the time-major padded layout:
    # row t*Bp + b of x_flat == embedding of token (b, t).
    # TODO(synk): could fuse the gather into the kernel via scalar prefetch at
    # large T*B; at these sizes it is noise.
    tok_tm = jnp.transpose(x_tokens, (1, 0))                     # (T, B)
    x_emb = jnp.take(params["embedding"], tok_tm, axis=0)        # (T, B, E) f32
    if Bp != B:
        x_emb = jnp.pad(x_emb, ((0, 0), (0, Bp - B), (0, 0)))
        h0 = jnp.pad(h0, ((0, 0), (0, Bp - B), (0, 0)))
        c0 = jnp.pad(c0, ((0, 0), (0, Bp - B), (0, 0)))
    x_flat = x_emb.reshape(T * Bp, E).astype(jnp.bfloat16)

    # Pack weights: gate reorder [i,f,g,o]->[i,f,o,g]; bf16 MXU operands,
    # f32 accumulation; bias stays f32.
    flat_w = []
    for p in params["lstm"]:
        flat_w += [_reorder_gates_ifog(p["w_ih"]).astype(jnp.bfloat16),
                   _reorder_gates_ifog(p["w_hh"]).astype(jnp.bfloat16),
                   _reorder_gates_ifog(p["bias"])]

    sig, h_n, c_n = _fused_call(x_flat, flat_w, h0, c0,
                                params["fc_w"], params["fc_b"], T)

    # PyTorch: sig.view(B,-1)[:, -1] == output feature O-1 of timestep T-1,
    # i.e. column O-1 of sigmoid(fc(h_T of the last layer)).  Strip batch pad.
    sig_out = sig[:B, -1]
    return sig_out, (h_n[:, :B], c_n[:, :B])


# ----------------------------------------------------------------------------
# Deterministic parameter construction (shapes follow initialize_layers()).
# ----------------------------------------------------------------------------
def make_params(key, vocab_size, embedding_dim, hidden_dim, output_dim, no_layers):
    keys = jax.random.split(key, 3 + 4 * no_layers)
    params = {}
    params["embedding"] = 0.1 * jax.random.normal(
        keys[0], (vocab_size, embedding_dim), dtype=jnp.float32)

    lstm_params = []
    kidx = 1
    for l in range(no_layers):
        in_dim = embedding_dim if l == 0 else hidden_dim
        w_ih = 0.1 * jax.random.normal(keys[kidx], (in_dim, 4 * hidden_dim),
                                       dtype=jnp.float32)
        w_hh = 0.1 * jax.random.normal(keys[kidx + 1], (hidden_dim, 4 * hidden_dim),
                                       dtype=jnp.float32)
        b_ih = 0.1 * jax.random.normal(keys[kidx + 2], (4 * hidden_dim,),
                                       dtype=jnp.float32)
        b_hh = 0.1 * jax.random.normal(keys[kidx + 3], (4 * hidden_dim,),
                                       dtype=jnp.float32)
        lstm_params.append({"w_ih": w_ih, "w_hh": w_hh,
                            "bias": (b_ih + b_hh).reshape(1, -1)})
        kidx += 4
    params["lstm"] = lstm_params

    params["fc_w"] = 0.1 * jax.random.normal(
        keys[kidx], (hidden_dim, output_dim), dtype=jnp.float32)
    params["fc_b"] = 0.1 * jax.random.normal(
        keys[kidx + 1], (1, output_dim), dtype=jnp.float32)
    return params


# ----------------------------------------------------------------------------
# Pure-JAX reference (mirrors the PyTorch forward, eval-mode dropout,
# PyTorch gate order [i, f, g, o]).
# ----------------------------------------------------------------------------
def _reference_forward(x_tokens, hidden, params):
    h0_all, c0_all = hidden
    L, B, H = h0_all.shape
    T = x_tokens.shape[1]
    layer_in = jnp.take(params["embedding"], x_tokens, axis=0)   # (B, T, E)
    hs, cs = [], []
    for l in range(L):
        w_ih = params["lstm"][l]["w_ih"]
        w_hh = params["lstm"][l]["w_hh"]
        bias = params["lstm"][l]["bias"]
        h = h0_all[l]
        c = c0_all[l]
        outs = []
        for t in range(T):
            gates = layer_in[:, t, :] @ w_ih + h @ w_hh + bias
            i = jax.nn.sigmoid(gates[:, 0 * H:1 * H])
            f = jax.nn.sigmoid(gates[:, 1 * H:2 * H])
            g = jnp.tanh(gates[:, 2 * H:3 * H])
            o = jax.nn.sigmoid(gates[:, 3 * H:4 * H])
            c = f * c + i * g
            h = o * jnp.tanh(c)
            outs.append(h)
        layer_in = jnp.stack(outs, axis=1)
        hs.append(h)
        cs.append(c)
    lstm_out = layer_in.reshape(-1, H)
    sig = jax.nn.sigmoid(lstm_out @ params["fc_w"] + params["fc_b"])
    sig = sig.reshape(x_tokens.shape[0], -1)
    return sig[:, -1], (jnp.stack(hs, axis=0), jnp.stack(cs, axis=0))


if __name__ == "__main__":
    # Small, forward-consistent shapes.
    B, T = 2, 8
    embedding_dim = 16
    hidden_dim = 32
    output_dim = 1
    no_layers = 2
    vocab_size = 50          # len(vocab) + 1

    key = jax.random.PRNGKey(0)
    pkey, xkey = jax.random.split(key)

    params = make_params(pkey, vocab_size, embedding_dim, hidden_dim,
                         output_dim, no_layers)
    x_tokens = jax.random.randint(xkey, (B, T), 0, vocab_size, dtype=jnp.int32)

    # init_hidden: zeros of shape (no_layers, batch, hidden_dim)
    h0 = jnp.zeros((no_layers, B, hidden_dim), dtype=jnp.float32)
    c0 = jnp.zeros((no_layers, B, hidden_dim), dtype=jnp.float32)

    fwd = jax.jit(lstm_analyzer_forward)
    sig_out, (h_n, c_n) = fwd(x_tokens, (h0, c0), params)
    jax.block_until_ready((sig_out, h_n, c_n))

    assert sig_out.shape == (B,)
    assert h_n.shape == (no_layers, B, hidden_dim)
    assert c_n.shape == (no_layers, B, hidden_dim)
    assert bool(jnp.all((sig_out >= 0.0) & (sig_out <= 1.0)))
    assert bool(jnp.all(jnp.isfinite(h_n)) and jnp.all(jnp.isfinite(c_n)))

    # Correctness vs. pure-JAX reference.  Kernel uses bf16 MXU operands with
    # f32 accumulation; observed error here is ~1e-3, tolerance has margin.
    ref_sig, (ref_h, ref_c) = _reference_forward(x_tokens, (h0, c0), params)
    assert bool(jnp.allclose(sig_out, ref_sig, atol=1e-2, rtol=1e-2))
    assert bool(jnp.allclose(h_n, ref_h, atol=1e-2, rtol=1e-2))
    assert bool(jnp.allclose(c_n, ref_c, atol=1e-2, rtol=1e-2))

    print("KERNEL_OK")
</pallas_src>

<mosaic_0001>
module attributes {stable_mosaic.version = 11 : i64} {
  func.func @kernel(%arg0: memref<64x16xbf16, #tpu.memory_space<vmem>>, %arg1: memref<16x128xbf16, #tpu.memory_space<vmem>>, %arg2: memref<32x128xbf16, #tpu.memory_space<vmem>>, %arg3: memref<1x128xf32, #tpu.memory_space<vmem>>, %arg4: memref<32x128xbf16, #tpu.memory_space<vmem>>, %arg5: memref<32x128xbf16, #tpu.memory_space<vmem>>, %arg6: memref<1x128xf32, #tpu.memory_space<vmem>>, %arg7: memref<2x8x32xf32, #tpu.memory_space<vmem>>, %arg8: memref<2x8x32xf32, #tpu.memory_space<vmem>>, %arg9: memref<32x1xf32, #tpu.memory_space<vmem>>, %arg10: memref<1x1xf32, #tpu.memory_space<vmem>>, %arg11: memref<8x1xf32, #tpu.memory_space<vmem>>, %arg12: memref<2x8x32xf32, #tpu.memory_space<vmem>>, %arg13: memref<2x8x32xf32, #tpu.memory_space<vmem>>) attributes {dimension_semantics = [], scalar_prefetch = 0 : i64, scratch_operands = 0 : i64, tpu.core_type = #tpu.core_type<tc>} {
    %c0 = arith.constant 0 : index
    %c0_0 = arith.constant 0 : index
    %0 = vector.load %arg1[%c0, %c0_0] : memref<16x128xbf16, #tpu.memory_space<vmem>>, vector<16x128xbf16>
    %c0_1 = arith.constant 0 : index
    %c0_2 = arith.constant 0 : index
    %1 = vector.load %arg4[%c0_1, %c0_2] : memref<32x128xbf16, #tpu.memory_space<vmem>>, vector<32x128xbf16>
    %c0_3 = arith.constant 0 : index
    %c0_4 = arith.constant 0 : index
    %2 = vector.load %arg2[%c0_3, %c0_4] : memref<32x128xbf16, #tpu.memory_space<vmem>>, vector<32x128xbf16>
    %c0_5 = arith.constant 0 : index
    %c0_6 = arith.constant 0 : index
    %3 = vector.load %arg5[%c0_5, %c0_6] : memref<32x128xbf16, #tpu.memory_space<vmem>>, vector<32x128xbf16>
    %c0_7 = arith.constant 0 : index
    %c0_8 = arith.constant 0 : index
    %4 = vector.load %arg3[%c0_7, %c0_8] : memref<1x128xf32, #tpu.memory_space<vmem>>, vector<1x128xf32>
    %c0_9 = arith.constant 0 : index
    %c0_10 = arith.constant 0 : index
    %5 = vector.load %arg6[%c0_9, %c0_10] : memref<1x128xf32, #tpu.memory_space<vmem>>, vector<1x128xf32>
    %6 = vector.shape_cast %5 : vector<1x128xf32> to vector<1x128xf32>
    %7 = vector.broadcast %6 : vector<1x128xf32> to vector<8x128xf32>
    %c0_11 = arith.constant 0 : index
    %c0_12 = arith.constant 0 : index
    %8 = vector.load %arg0[%c0_11, %c0_12] : memref<64x16xbf16, #tpu.memory_space<vmem>>, vector<64x16xbf16>
    %cst = arith.constant dense<0.000000e+00> : vector<64x128xf32>
    %9 = tpu.matmul %8, %0, %cst {dimension_numbers = #tpu.dot_dimension_numbers<[1], [0], [0], [1], [0, 0, 1, 1], [], []>} : vector<64x16xbf16>, vector<16x128xbf16>, vector<64x128xf32> -> vector<64x128xf32>
    %10 = vector.broadcast %4 : vector<1x128xf32> to vector<64x128xf32>
    %11 = arith.addf %9, %10 : vector<64x128xf32>
    %c0_13 = arith.constant 0 : index
    %c0_14 = arith.constant 0 : index
    %c0_15 = arith.constant 0 : index
    %12 = vector.load %arg7[%c0_13, %c0_14, %c0_15] : memref<2x8x32xf32, #tpu.memory_space<vmem>>, vector<1x8x32xf32>
    %13 = vector.shape_cast %12 : vector<1x8x32xf32> to vector<8x32xf32>
    %c1 = arith.constant 1 : index
    %c0_16 = arith.constant 0 : index
    %c0_17 = arith.constant 0 : index
    %14 = vector.load %arg7[%c1, %c0_16, %c0_17] : memref<2x8x32xf32, #tpu.memory_space<vmem>>, vector<1x8x32xf32>
    %15 = vector.shape_cast %14 : vector<1x8x32xf32> to vector<8x32xf32>
    %c0_18 = arith.constant 0 : index
    %c0_19 = arith.constant 0 : index
    %c0_20 = arith.constant 0 : index
    %16 = vector.load %arg8[%c0_18, %c0_19, %c0_20] : memref<2x8x32xf32, #tpu.memory_space<vmem>>, vector<1x8x32xf32>
    %17 = vector.shape_cast %16 : vector<1x8x32xf32> to vector<8x32xf32>
    %c1_21 = arith.constant 1 : index
    %c0_22 = arith.constant 0 : index
    %c0_23 = arith.constant 0 : index
    %18 = vector.load %arg8[%c1_21, %c0_22, %c0_23] : memref<2x8x32xf32, #tpu.memory_space<vmem>>, vector<1x8x32xf32>
    %19 = vector.shape_cast %18 : vector<1x8x32xf32> to vector<8x32xf32>
    %20 = vector.extract_strided_slice %11 {offsets = [0, 0], sizes = [8, 128], strides = [1, 1]} : vector<64x128xf32> to vector<8x128xf32>
    %21 = arith.truncf %13 : vector<8x32xf32> to vector<8x32xbf16>
    %cst_24 = arith.constant dense<0.000000e+00> : vector<8x128xf32>
    %22 = tpu.matmul %21, %2, %cst_24 {dimension_numbers = #tpu.dot_dimension_numbers<[1], [0], [0], [1], [0, 0, 1, 1], [], []>} : vector<8x32xbf16>, vector<32x128xbf16>, vector<8x128xf32> -> vector<8x128xf32>
    %23 = arith.addf %20, %22 : vector<8x128xf32>
    %24 = vector.extract_strided_slice %23 {offsets = [0, 0], sizes = [8, 96], strides = [1, 1]} : vector<8x128xf32> to vector<8x96xf32>
    %25 = arith.negf %24 : vector<8x96xf32>
    %26 = math.exp %25 : vector<8x96xf32>
    %cst_25 = arith.constant 1.000000e+00 : f32
    %27 = vector.broadcast %cst_25 : f32 to vector<8x96xf32>
    %28 = arith.addf %27, %26 : vector<8x96xf32>
    %29 = arith.divf %27, %28 : vector<8x96xf32>
    %30 = vector.extract_strided_slice %23 {offsets = [0, 96], sizes = [8, 32], strides = [1, 1]} : vector<8x128xf32> to vector<8x32xf32>
    %31 = math.tanh %30 : vector<8x32xf32>
    %32 = vector.extract_strided_slice %29 {offsets = [0, 0], sizes = [8, 32], strides = [1, 1]} : vector<8x96xf32> to vector<8x32xf32>
    %33 = vector.extract_strided_slice %29 {offsets = [0, 32], sizes = [8, 32], strides = [1, 1]} : vector<8x96xf32> to vector<8x32xf32>
    %34 = vector.extract_strided_slice %29 {offsets = [0, 64], sizes = [8, 32], strides = [1, 1]} : vector<8x96xf32> to vector<8x32xf32>
    %35 = arith.mulf %33, %17 : vector<8x32xf32>
    %36 = arith.mulf %32, %31 : vector<8x32xf32>
    %37 = arith.addf %35, %36 : vector<8x32xf32>
    %38 = math.tanh %37 : vector<8x32xf32>
    %39 = arith.mulf %34, %38 : vector<8x32xf32>
    %40 = arith.truncf %39 : vector<8x32xf32> to vector<8x32xbf16>
    %cst_26 = arith.constant dense<0.000000e+00> : vector<8x128xf32>
    %41 = tpu.matmul %40, %1, %cst_26 {dimension_numbers = #tpu.dot_dimension_numbers<[1], [0], [0], [1], [0, 0, 1, 1], [], []>} : vector<8x32xbf16>, vector<32x128xbf16>, vector<8x128xf32> -> vector<8x128xf32>
    %42 = arith.addf %41, %7 : vector<8x128xf32>
    %43 = arith.truncf %15 : vector<8x32xf32> to vector<8x32xbf16>
    %cst_27 = arith.constant dense<0.000000e+00> : vector<8x128xf32>
    %44 = tpu.matmul %43, %3, %cst_27 {dimension_numbers = #tpu.dot_dimension_numbers<[1], [0], [0], [1], [0, 0, 1, 1], [], []>} : vector<8x32xbf16>, vector<32x128xbf16>, vector<8x128xf32> -> vector<8x128xf32>
    %45 = arith.addf %42, %44 : vector<8x128xf32>
    %46 = vector.extract_strided_slice %45 {offsets = [0, 0], sizes = [8, 96], strides = [1, 1]} : vector<8x128xf32> to vector<8x96xf32>
    %47 = arith.negf %46 : vector<8x96xf32>
    %48 = math.exp %47 : vector<8x96xf32>
    %cst_28 = arith.constant 1.000000e+00 : f32
    %49 = vector.broadcast %cst_28 : f32 to vector<8x96xf32>
    %50 = arith.addf %49, %48 : vector<8x96xf32>
    %51 = arith.divf %49, %50 : vector<8x96xf32>
    %52 = vector.extract_strided_slice %45 {offsets = [0, 96], sizes = [8, 32], strides = [1, 1]} : vector<8x128xf32> to vector<8x32xf32>
    %53 = math.tanh %52 : vector<8x32xf32>
    %54 = vector.extract_strided_slice %51 {offsets = [0, 0], sizes = [8, 32], strides = [1, 1]} : vector<8x96xf32> to vector<8x32xf32>
    %55 = vector.extract_strided_slice %51 {offsets = [0, 32], sizes = [8, 32], strides = [1, 1]} : vector<8x96xf32> to vector<8x32xf32>
    %56 = vector.extract_strided_slice %51 {offsets = [0, 64], sizes = [8, 32], strides = [1, 1]} : vector<8x96xf32> to vector<8x32xf32>
    %57 = arith.mulf %55, %19 : vector<8x32xf32>
    %58 = arith.mulf %54, %53 : vector<8x32xf32>
    %59 = arith.addf %57, %58 : vector<8x32xf32>
    %60 = math.tanh %59 : vector<8x32xf32>
    %61 = arith.mulf %56, %60 : vector<8x32xf32>
    %62 = vector.extract_strided_slice %11 {offsets = [8, 0], sizes = [8, 128], strides = [1, 1]} : vector<64x128xf32> to vector<8x128xf32>
    %63 = arith.truncf %39 : vector<8x32xf32> to vector<8x32xbf16>
    %cst_29 = arith.constant dense<0.000000e+00> : vector<8x128xf32>
    %64 = tpu.matmul %63, %2, %cst_29 {dimension_numbers = #tpu.dot_dimension_numbers<[1], [0], [0], [1], [0, 0, 1, 1], [], []>} : vector<8x32xbf16>, vector<32x128xbf16>, vector<8x128xf32> -> vector<8x128xf32>
    %65 = arith.addf %62, %64 : vector<8x128xf32>
    %66 = vector.extract_strided_slice %65 {offsets = [0, 0], sizes = [8, 96], strides = [1, 1]} : vector<8x128xf32> to vector<8x96xf32>
    %67 = arith.negf %66 : vector<8x96xf32>
    %68 = math.exp %67 : vector<8x96xf32>
    %cst_30 = arith.constant 1.000000e+00 : f32
    %69 = vector.broadcast %cst_30 : f32 to vector<8x96xf32>
    %70 = arith.addf %69, %68 : vector<8x96xf32>
    %71 = arith.divf %69, %70 : vector<8x96xf32>
    %72 = vector.extract_strided_slice %65 {offsets = [0, 96], sizes = [8, 32], strides = [1, 1]} : vector<8x128xf32> to vector<8x32xf32>
    %73 = math.tanh %72 : vector<8x32xf32>
    %74 = vector.extract_strided_slice %71 {offsets = [0, 0], sizes = [8, 32], strides = [1, 1]} : vector<8x96xf32> to vector<8x32xf32>
    %75 = vector.extract_strided_slice %71 {offsets = [0, 32], sizes = [8, 32], strides = [1, 1]} : vector<8x96xf32> to vector<8x32xf32>
    %76 = vector.extract_strided_slice %71 {offsets = [0, 64], sizes = [8, 32], strides = [1, 1]} : vector<8x96xf32> to vector<8x32xf32>
    %77 = arith.mulf %75, %37 : vector<8x32xf32>
    %78 = arith.mulf %74, %73 : vector<8x32xf32>
    %79 = arith.addf %77, %78 : vector<8x32xf32>
    %80 = math.tanh %79 : vector<8x32xf32>
    %81 = arith.mulf %76, %80 : vector<8x32xf32>
    %82 = arith.truncf %81 : vector<8x32xf32> to vector<8x32xbf16>
    %cst_31 = arith.constant dense<0.000000e+00> : vector<8x128xf32>
    %83 = tpu.matmul %82, %1, %cst_31 {dimension_numbers = #tpu.dot_dimension_numbers<[1], [0], [0], [1], [0, 0, 1, 1], [], []>} : vector<8x32xbf16>, vector<32x128xbf16>, vector<8x128xf32> -> vector<8x128xf32>
    %84 = arith.addf %83, %7 : vector<8x128xf32>
    %85 = arith.truncf %61 : vector<8x32xf32> to vector<8x32xbf16>
    %cst_32 = arith.constant dense<0.000000e+00> : vector<8x128xf32>
    %86 = tpu.matmul %85, %3, %cst_32 {dimension_numbers = #tpu.dot_dimension_numbers<[1], [0], [0], [1], [0, 0, 1, 1], [], []>} : vector<8x32xbf16>, vector<32x128xbf16>, vector<8x128xf32> -> vector<8x128xf32>
    %87 = arith.addf %84, %86 : vector<8x128xf32>
    %88 = vector.extract_strided_slice %87 {offsets = [0, 0], sizes = [8, 96], strides = [1, 1]} : vector<8x128xf32> to vector<8x96xf32>
    %89 = arith.negf %88 : vector<8x96xf32>
    %90 = math.exp %89 : vector<8x96xf32>
    %cst_33 = arith.constant 1.000000e+00 : f32
    %91 = vector.broadcast %cst_33 : f32 to vector<8x96xf32>
    %92 = arith.addf %91, %90 : vector<8x96xf32>
    %93 = arith.divf %91, %92 : vector<8x96xf32>
    %94 = vector.extract_strided_slice %87 {offsets = [0, 96], sizes = [8, 32], strides = [1, 1]} : vector<8x128xf32> to vector<8x32xf32>
    %95 = math.tanh %94 : vector<8x32xf32>
    %96 = vector.extract_strided_slice %93 {offsets = [0, 0], sizes = [8, 32], strides = [1, 1]} : vector<8x96xf32> to vector<8x32xf32>
    %97 = vector.extract_strided_slice %93 {offsets = [0, 32], sizes = [8, 32], strides = [1, 1]} : vector<8x96xf32> to vector<8x32xf32>
    %98 = vector.extract_strided_slice %93 {offsets = [0, 64], sizes = [8, 32], strides = [1, 1]} : vector<8x96xf32> to vector<8x32xf32>
    %99 = arith.mulf %97, %59 : vector<8x32xf32>
    %100 = arith.mulf %96, %95 : vector<8x32xf32>
    %101 = arith.addf %99, %100 : vector<8x32xf32>
    %102 = math.tanh %101 : vector<8x32xf32>
    %103 = arith.mulf %98, %102 : vector<8x32xf32>
    %104 = vector.extract_strided_slice %11 {offsets = [16, 0], sizes = [8, 128], strides = [1, 1]} : vector<64x128xf32> to vector<8x128xf32>
    %105 = arith.truncf %81 : vector<8x32xf32> to vector<8x32xbf16>
    %cst_34 = arith.constant dense<0.000000e+00> : vector<8x128xf32>
    %106 = tpu.matmul %105, %2, %cst_34 {dimension_numbers = #tpu.dot_dimension_numbers<[1], [0], [0], [1], [0, 0, 1, 1], [], []>} : vector<8x32xbf16>, vector<32x128xbf16>, vector<8x128xf32> -> vector<8x128xf32>
    %107 = arith.addf %104, %106 : vector<8x128xf32>
    %108 = vector.extract_strided_slice %107 {offsets = [0, 0], sizes = [8, 96], strides = [1, 1]} : vector<8x128xf32> to vector<8x96xf32>
    %109 = arith.negf %108 : vector<8x96xf32>
    %110 = math.exp %109 : vector<8x96xf32>
    %cst_35 = arith.constant 1.000000e+00 : f32
    %111 = vector.broadcast %cst_35 : f32 to vector<8x96xf32>
    %112 = arith.addf %111, %110 : vector<8x96xf32>
    %113 = arith.divf %111, %112 : vector<8x96xf32>
    %114 = vector.extract_strided_slice %107 {offsets = [0, 96], sizes = [8, 32], strides = [1, 1]} : vector<8x128xf32> to vector<8x32xf32>
    %115 = math.tanh %114 : vector<8x32xf32>
    %116 = vector.extract_strided_slice %113 {offsets = [0, 0], sizes = [8, 32], strides = [1, 1]} : vector<8x96xf32> to vector<8x32xf32>
    %117 = vector.extract_strided_slice %113 {offsets = [0, 32], sizes = [8, 32], strides = [1, 1]} : vector<8x96xf32> to vector<8x32xf32>
    %118 = vector.extract_strided_slice %113 {offsets = [0, 64], sizes = [8, 32], strides = [1, 1]} : vector<8x96xf32> to vector<8x32xf32>
    %119 = arith.mulf %117, %79 : vector<8x32xf32>
    %120 = arith.mulf %116, %115 : vector<8x32xf32>
    %121 = arith.addf %119, %120 : vector<8x32xf32>
    %122 = math.tanh %121 : vector<8x32xf32>
    %123 = arith.mulf %118, %122 : vector<8x32xf32>
    %124 = arith.truncf %123 : vector<8x32xf32> to vector<8x32xbf16>
    %cst_36 = arith.constant dense<0.000000e+00> : vector<8x128xf32>
    %125 = tpu.matmul %124, %1, %cst_36 {dimension_numbers = #tpu.dot_dimension_numbers<[1], [0], [0], [1], [0, 0, 1, 1], [], []>} : vector<8x32xbf16>, vector<32x128xbf16>, vector<8x128xf32> -> vector<8x128xf32>
    %126 = arith.addf %125, %7 : vector<8x128xf32>
    %127 = arith.truncf %103 : vector<8x32xf32> to vector<8x32xbf16>
    %cst_37 = arith.constant dense<0.000000e+00> : vector<8x128xf32>
    %128 = tpu.matmul %127, %3, %cst_37 {dimension_numbers = #tpu.dot_dimension_numbers<[1], [0], [0], [1], [0, 0, 1, 1], [], []>} : vector<8x32xbf16>, vector<32x128xbf16>, vector<8x128xf32> -> vector<8x128xf32>
    %129 = arith.addf %126, %128 : vector<8x128xf32>
    %130 = vector.extract_strided_slice %129 {offsets = [0, 0], sizes = [8, 96], strides = [1, 1]} : vector<8x128xf32> to vector<8x96xf32>
    %131 = arith.negf %130 : vector<8x96xf32>
    %132 = math.exp %131 : vector<8x96xf32>
    %cst_38 = arith.constant 1.000000e+00 : f32
    %133 = vector.broadcast %cst_38 : f32 to vector<8x96xf32>
    %134 = arith.addf %133, %132 : vector<8x96xf32>
    %135 = arith.divf %133, %134 : vector<8x96xf32>
    %136 = vector.extract_strided_slice %129 {offsets = [0, 96], sizes = [8, 32], strides = [1, 1]} : vector<8x128xf32> to vector<8x32xf32>
    %137 = math.tanh %136 : vector<8x32xf32>
    %138 = vector.extract_strided_slice %135 {offsets = [0, 0], sizes = [8, 32], strides = [1, 1]} : vector<8x96xf32> to vector<8x32xf32>
    %139 = vector.extract_strided_slice %135 {offsets = [0, 32], sizes = [8, 32], strides = [1, 1]} : vector<8x96xf32> to vector<8x32xf32>
    %140 = vector.extract_strided_slice %135 {offsets = [0, 64], sizes = [8, 32], strides = [1, 1]} : vector<8x96xf32> to vector<8x32xf32>
    %141 = arith.mulf %139, %101 : vector<8x32xf32>
    %142 = arith.mulf %138, %137 : vector<8x32xf32>
    %143 = arith.addf %141, %142 : vector<8x32xf32>
    %144 = math.tanh %143 : vector<8x32xf32>
    %145 = arith.mulf %140, %144 : vector<8x32xf32>
    %146 = vector.extract_strided_slice %11 {offsets = [24, 0], sizes = [8, 128], strides = [1, 1]} : vector<64x128xf32> to vector<8x128xf32>
    %147 = arith.truncf %123 : vector<8x32xf32> to vector<8x32xbf16>
    %cst_39 = arith.constant dense<0.000000e+00> : vector<8x128xf32>
    %148 = tpu.matmul %147, %2, %cst_39 {dimension_numbers = #tpu.dot_dimension_numbers<[1], [0], [0], [1], [0, 0, 1, 1], [], []>} : vector<8x32xbf16>, vector<32x128xbf16>, vector<8x128xf32> -> vector<8x128xf32>
    %149 = arith.addf %146, %148 : vector<8x128xf32>
    %150 = vector.extract_strided_slice %149 {offsets = [0, 0], sizes = [8, 96], strides = [1, 1]} : vector<8x128xf32> to vector<8x96xf32>
    %151 = arith.negf %150 : vector<8x96xf32>
    %152 = math.exp %151 : vector<8x96xf32>
    %cst_40 = arith.constant 1.000000e+00 : f32
    %153 = vector.broadcast %cst_40 : f32 to vector<8x96xf32>
    %154 = arith.addf %153, %152 : vector<8x96xf32>
    %155 = arith.divf %153, %154 : vector<8x96xf32>
    %156 = vector.extract_strided_slice %149 {offsets = [0, 96], sizes = [8, 32], strides = [1, 1]} : vector<8x128xf32> to vector<8x32xf32>
    %157 = math.tanh %156 : vector<8x32xf32>
    %158 = vector.extract_strided_slice %155 {offsets = [0, 0], sizes = [8, 32], strides = [1, 1]} : vector<8x96xf32> to vector<8x32xf32>
    %159 = vector.extract_strided_slice %155 {offsets = [0, 32], sizes = [8, 32], strides = [1, 1]} : vector<8x96xf32> to vector<8x32xf32>
    %160 = vector.extract_strided_slice %155 {offsets = [0, 64], sizes = [8, 32], strides = [1, 1]} : vector<8x96xf32> to vector<8x32xf32>
    %161 = arith.mulf %159, %121 : vector<8x32xf32>
    %162 = arith.mulf %158, %157 : vector<8x32xf32>
    %163 = arith.addf %161, %162 : vector<8x32xf32>
    %164 = math.tanh %163 : vector<8x32xf32>
    %165 = arith.mulf %160, %164 : vector<8x32xf32>
    %166 = arith.truncf %165 : vector<8x32xf32> to vector<8x32xbf16>
    %cst_41 = arith.constant dense<0.000000e+00> : vector<8x128xf32>
    %167 = tpu.matmul %166, %1, %cst_41 {dimension_numbers = #tpu.dot_dimension_numbers<[1], [0], [0], [1], [0, 0, 1, 1], [], []>} : vector<8x32xbf16>, vector<32x128xbf16>, vector<8x128xf32> -> vector<8x128xf32>
    %168 = arith.addf %167, %7 : vector<8x128xf32>
    %169 = arith.truncf %145 : vector<8x32xf32> to vector<8x32xbf16>
    %cst_42 = arith.constant dense<0.000000e+00> : vector<8x128xf32>
    %170 = tpu.matmul %169, %3, %cst_42 {dimension_numbers = #tpu.dot_dimension_numbers<[1], [0], [0], [1], [0, 0, 1, 1], [], []>} : vector<8x32xbf16>, vector<32x128xbf16>, vector<8x128xf32> -> vector<8x128xf32>
    %171 = arith.addf %168, %170 : vector<8x128xf32>
    %172 = vector.extract_strided_slice %171 {offsets = [0, 0], sizes = [8, 96], strides = [1, 1]} : vector<8x128xf32> to vector<8x96xf32>
    %173 = arith.negf %172 : vector<8x96xf32>
    %174 = math.exp %173 : vector<8x96xf32>
    %cst_43 = arith.constant 1.000000e+00 : f32
    %175 = vector.broadcast %cst_43 : f32 to vector<8x96xf32>
    %176 = arith.addf %175, %174 : vector<8x96xf32>
    %177 = arith.divf %175, %176 : vector<8x96xf32>
    %178 = vector.extract_strided_slice %171 {offsets = [0, 96], sizes = [8, 32], strides = [1, 1]} : vector<8x128xf32> to vector<8x32xf32>
    %179 = math.tanh %178 : vector<8x32xf32>
    %180 = vector.extract_strided_slice %177 {offsets = [0, 0], sizes = [8, 32], strides = [1, 1]} : vector<8x96xf32> to vector<8x32xf32>
    %181 = vector.extract_strided_slice %177 {offsets = [0, 32], sizes = [8, 32], strides = [1, 1]} : vector<8x96xf32> to vector<8x32xf32>
    %182 = vector.extract_strided_slice %177 {offsets = [0, 64], sizes = [8, 32], strides = [1, 1]} : vector<8x96xf32> to vector<8x32xf32>
    %183 = arith.mulf %181, %143 : vector<8x32xf32>
    %184 = arith.mulf %180, %179 : vector<8x32xf32>
    %185 = arith.addf %183, %184 : vector<8x32xf32>
    %186 = math.tanh %185 : vector<8x32xf32>
    %187 = arith.mulf %182, %186 : vector<8x32xf32>
    %188 = vector.extract_strided_slice %11 {offsets = [32, 0], sizes = [8, 128], strides = [1, 1]} : vector<64x128xf32> to vector<8x128xf32>
    %189 = arith.truncf %165 : vector<8x32xf32> to vector<8x32xbf16>
    %cst_44 = arith.constant dense<0.000000e+00> : vector<8x128xf32>
    %190 = tpu.matmul %189, %2, %cst_44 {dimension_numbers = #tpu.dot_dimension_numbers<[1], [0], [0], [1], [0, 0, 1, 1], [], []>} : vector<8x32xbf16>, vector<32x128xbf16>, vector<8x128xf32> -> vector<8x128xf32>
    %191 = arith.addf %188, %190 : vector<8x128xf32>
    %192 = vector.extract_strided_slice %191 {offsets = [0, 0], sizes = [8, 96], strides = [1, 1]} : vector<8x128xf32> to vector<8x96xf32>
    %193 = arith.negf %192 : vector<8x96xf32>
    %194 = math.exp %193 : vector<8x96xf32>
    %cst_45 = arith.constant 1.000000e+00 : f32
    %195 = vector.broadcast %cst_45 : f32 to vector<8x96xf32>
    %196 = arith.addf %195, %194 : vector<8x96xf32>
    %197 = arith.divf %195, %196 : vector<8x96xf32>
    %198 = vector.extract_strided_slice %191 {offsets = [0, 96], sizes = [8, 32], strides = [1, 1]} : vector<8x128xf32> to vector<8x32xf32>
    %199 = math.tanh %198 : vector<8x32xf32>
    %200 = vector.extract_strided_slice %197 {offsets = [0, 0], sizes = [8, 32], strides = [1, 1]} : vector<8x96xf32> to vector<8x32xf32>
    %201 = vector.extract_strided_slice %197 {offsets = [0, 32], sizes = [8, 32], strides = [1, 1]} : vector<8x96xf32> to vector<8x32xf32>
    %202 = vector.extract_strided_slice %197 {offsets = [0, 64], sizes = [8, 32], strides = [1, 1]} : vector<8x96xf32> to vector<8x32xf32>
    %203 = arith.mulf %201, %163 : vector<8x32xf32>
    %204 = arith.mulf %200, %199 : vector<8x32xf32>
    %205 = arith.addf %203, %204 : vector<8x32xf32>
    %206 = math.tanh %205 : vector<8x32xf32>
    %207 = arith.mulf %202, %206 : vector<8x32xf32>
    %208 = arith.truncf %207 : vector<8x32xf32> to vector<8x32xbf16>
    %cst_46 = arith.constant dense<0.000000e+00> : vector<8x128xf32>
    %209 = tpu.matmul %208, %1, %cst_46 {dimension_numbers = #tpu.dot_dimension_numbers<[1], [0], [0], [1], [0, 0, 1, 1], [], []>} : vector<8x32xbf16>, vector<32x128xbf16>, vector<8x128xf32> -> vector<8x128xf32>
    %210 = arith.addf %209, %7 : vector<8x128xf32>
    %211 = arith.truncf %187 : vector<8x32xf32> to vector<8x32xbf16>
    %cst_47 = arith.constant dense<0.000000e+00> : vector<8x128xf32>
    %212 = tpu.matmul %211, %3, %cst_47 {dimension_numbers = #tpu.dot_dimension_numbers<[1], [0], [0], [1], [0, 0, 1, 1], [], []>} : vector<8x32xbf16>, vector<32x128xbf16>, vector<8x128xf32> -> vector<8x128xf32>
    %213 = arith.addf %210, %212 : vector<8x128xf32>
    %214 = vector.extract_strided_slice %213 {offsets = [0, 0], sizes = [8, 96], strides = [1, 1]} : vector<8x128xf32> to vector<8x96xf32>
    %215 = arith.negf %214 : vector<8x96xf32>
    %216 = math.exp %215 : vector<8x96xf32>
    %cst_48 = arith.constant 1.000000e+00 : f32
    %217 = vector.broadcast %cst_48 : f32 to vector<8x96xf32>
    %218 = arith.addf %217, %216 : vector<8x96xf32>
    %219 = arith.divf %217, %218 : vector<8x96xf32>
    %220 = vector.extract_strided_slice %213 {offsets = [0, 96], sizes = [8, 32], strides = [1, 1]} : vector<8x128xf32> to vector<8x32xf32>
    %221 = math.tanh %220 : vector<8x32xf32>
    %222 = vector.extract_strided_slice %219 {offsets = [0, 0], sizes = [8, 32], strides = [1, 1]} : vector<8x96xf32> to vector<8x32xf32>
    %223 = vector.extract_strided_slice %219 {offsets = [0, 32], sizes = [8, 32], strides = [1, 1]} : vector<8x96xf32> to vector<8x32xf32>
    %224 = vector.extract_strided_slice %219 {offsets = [0, 64], sizes = [8, 32], strides = [1, 1]} : vector<8x96xf32> to vector<8x32xf32>
    %225 = arith.mulf %223, %185 : vector<8x32xf32>
    %226 = arith.mulf %222, %221 : vector<8x32xf32>
    %227 = arith.addf %225, %226 : vector<8x32xf32>
    %228 = math.tanh %227 : vector<8x32xf32>
    %229 = arith.mulf %224, %228 : vector<8x32xf32>
    %230 = vector.extract_strided_slice %11 {offsets = [40, 0], sizes = [8, 128], strides = [1, 1]} : vector<64x128xf32> to vector<8x128xf32>
    %231 = arith.truncf %207 : vector<8x32xf32> to vector<8x32xbf16>
    %cst_49 = arith.constant dense<0.000000e+00> : vector<8x128xf32>
    %232 = tpu.matmul %231, %2, %cst_49 {dimension_numbers = #tpu.dot_dimension_numbers<[1], [0], [0], [1], [0, 0, 1, 1], [], []>} : vector<8x32xbf16>, vector<32x128xbf16>, vector<8x128xf32> -> vector<8x128xf32>
    %233 = arith.addf %230, %232 : vector<8x128xf32>
    %234 = vector.extract_strided_slice %233 {offsets = [0, 0], sizes = [8, 96], strides = [1, 1]} : vector<8x128xf32> to vector<8x96xf32>
    %235 = arith.negf %234 : vector<8x96xf32>
    %236 = math.exp %235 : vector<8x96xf32>
    %cst_50 = arith.constant 1.000000e+00 : f32
    %237 = vector.broadcast %cst_50 : f32 to vector<8x96xf32>
    %238 = arith.addf %237, %236 : vector<8x96xf32>
    %239 = arith.divf %237, %238 : vector<8x96xf32>
    %240 = vector.extract_strided_slice %233 {offsets = [0, 96], sizes = [8, 32], strides = [1, 1]} : vector<8x128xf32> to vector<8x32xf32>
    %241 = math.tanh %240 : vector<8x32xf32>
    %242 = vector.extract_strided_slice %239 {offsets = [0, 0], sizes = [8, 32], strides = [1, 1]} : vector<8x96xf32> to vector<8x32xf32>
    %243 = vector.extract_strided_slice %239 {offsets = [0, 32], sizes = [8, 32], strides = [1, 1]} : vector<8x96xf32> to vector<8x32xf32>
    %244 = vector.extract_strided_slice %239 {offsets = [0, 64], sizes = [8, 32], strides = [1, 1]} : vector<8x96xf32> to vector<8x32xf32>
    %245 = arith.mulf %243, %205 : vector<8x32xf32>
    %246 = arith.mulf %242, %241 : vector<8x32xf32>
    %247 = arith.addf %245, %246 : vector<8x32xf32>
    %248 = math.tanh %247 : vector<8x32xf32>
    %249 = arith.mulf %244, %248 : vector<8x32xf32>
    %250 = arith.truncf %249 : vector<8x32xf32> to vector<8x32xbf16>
    %cst_51 = arith.constant dense<0.000000e+00> : vector<8x128xf32>
    %251 = tpu.matmul %250, %1, %cst_51 {dimension_numbers = #tpu.dot_dimension_numbers<[1], [0], [0], [1], [0, 0, 1, 1], [], []>} : vector<8x32xbf16>, vector<32x128xbf16>, vector<8x128xf32> -> vector<8x128xf32>
    %252 = arith.addf %251, %7 : vector<8x128xf32>
    %253 = arith.truncf %229 : vector<8x32xf32> to vector<8x32xbf16>
    %cst_52 = arith.constant dense<0.000000e+00> : vector<8x128xf32>
    %254 = tpu.matmul %253, %3, %cst_52 {dimension_numbers = #tpu.dot_dimension_numbers<[1], [0], [0], [1], [0, 0, 1, 1], [], []>} : vector<8x32xbf16>, vector<32x128xbf16>, vector<8x128xf32> -> vector<8x128xf32>
    %255 = arith.addf %252, %254 : vector<8x128xf32>
    %256 = vector.extract_strided_slice %255 {offsets = [0, 0], sizes = [8, 96], strides = [1, 1]} : vector<8x128xf32> to vector<8x96xf32>
    %257 = arith.negf %256 : vector<8x96xf32>
    %258 = math.exp %257 : vector<8x96xf32>
    %cst_53 = arith.constant 1.000000e+00 : f32
    %259 = vector.broadcast %cst_53 : f32 to vector<8x96xf32>
    %260 = arith.addf %259, %258 : vector<8x96xf32>
    %261 = arith.divf %259, %260 : vector<8x96xf32>
    %262 = vector.extract_strided_slice %255 {offsets = [0, 96], sizes = [8, 32], strides = [1, 1]} : vector<8x128xf32> to vector<8x32xf32>
    %263 = math.tanh %262 : vector<8x32xf32>
    %264 = vector.extract_strided_slice %261 {offsets = [0, 0], sizes = [8, 32], strides = [1, 1]} : vector<8x96xf32> to vector<8x32xf32>
    %265 = vector.extract_strided_slice %261 {offsets = [0, 32], sizes = [8, 32], strides = [1, 1]} : vector<8x96xf32> to vector<8x32xf32>
    %266 = vector.extract_strided_slice %261 {offsets = [0, 64], sizes = [8, 32], strides = [1, 1]} : vector<8x96xf32> to vector<8x32xf32>
    %267 = arith.mulf %265, %227 : vector<8x32xf32>
    %268 = arith.mulf %264, %263 : vector<8x32xf32>
    %269 = arith.addf %267, %268 : vector<8x32xf32>
    %270 = math.tanh %269 : vector<8x32xf32>
    %271 = arith.mulf %266, %270 : vector<8x32xf32>
    %272 = vector.extract_strided_slice %11 {offsets = [48, 0], sizes = [8, 128], strides = [1, 1]} : vector<64x128xf32> to vector<8x128xf32>
    %273 = arith.truncf %249 : vector<8x32xf32> to vector<8x32xbf16>
    %cst_54 = arith.constant dense<0.000000e+00> : vector<8x128xf32>
    %274 = tpu.matmul %273, %2, %cst_54 {dimension_numbers = #tpu.dot_dimension_numbers<[1], [0], [0], [1], [0, 0, 1, 1], [], []>} : vector<8x32xbf16>, vector<32x128xbf16>, vector<8x128xf32> -> vector<8x128xf32>
    %275 = arith.addf %272, %274 : vector<8x128xf32>
    %276 = vector.extract_strided_slice %275 {offsets = [0, 0], sizes = [8, 96], strides = [1, 1]} : vector<8x128xf32> to vector<8x96xf32>
    %277 = arith.negf %276 : vector<8x96xf32>
    %278 = math.exp %277 : vector<8x96xf32>
    %cst_55 = arith.constant 1.000000e+00 : f32
    %279 = vector.broadcast %cst_55 : f32 to vector<8x96xf32>
    %280 = arith.addf %279, %278 : vector<8x96xf32>
    %281 = arith.divf %279, %280 : vector<8x96xf32>
    %282 = vector.extract_strided_slice %275 {offsets = [0, 96], sizes = [8, 32], strides = [1, 1]} : vector<8x128xf32> to vector<8x32xf32>
    %283 = math.tanh %282 : vector<8x32xf32>
    %284 = vector.extract_strided_slice %281 {offsets = [0, 0], sizes = [8, 32], strides = [1, 1]} : vector<8x96xf32> to vector<8x32xf32>
    %285 = vector.extract_strided_slice %281 {offsets = [0, 32], sizes = [8, 32], strides = [1, 1]} : vector<8x96xf32> to vector<8x32xf32>
    %286 = vector.extract_strided_slice %281 {offsets = [0, 64], sizes = [8, 32], strides = [1, 1]} : vector<8x96xf32> to vector<8x32xf32>
    %287 = arith.mulf %285, %247 : vector<8x32xf32>
    %288 = arith.mulf %284, %283 : vector<8x32xf32>
    %289 = arith.addf %287, %288 : vector<8x32xf32>
    %290 = math.tanh %289 : vector<8x32xf32>
    %291 = arith.mulf %286, %290 : vector<8x32xf32>
    %292 = arith.truncf %291 : vector<8x32xf32> to vector<8x32xbf16>
    %cst_56 = arith.constant dense<0.000000e+00> : vector<8x128xf32>
    %293 = tpu.matmul %292, %1, %cst_56 {dimension_numbers = #tpu.dot_dimension_numbers<[1], [0], [0], [1], [0, 0, 1, 1], [], []>} : vector<8x32xbf16>, vector<32x128xbf16>, vector<8x128xf32> -> vector<8x128xf32>
    %294 = arith.addf %293, %7 : vector<8x128xf32>
    %295 = arith.truncf %271 : vector<8x32xf32> to vector<8x32xbf16>
    %cst_57 = arith.constant dense<0.000000e+00> : vector<8x128xf32>
    %296 = tpu.matmul %295, %3, %cst_57 {dimension_numbers = #tpu.dot_dimension_numbers<[1], [0], [0], [1], [0, 0, 1, 1], [], []>} : vector<8x32xbf16>, vector<32x128xbf16>, vector<8x128xf32> -> vector<8x128xf32>
    %297 = arith.addf %294, %296 : vector<8x128xf32>
    %298 = vector.extract_strided_slice %297 {offsets = [0, 0], sizes = [8, 96], strides = [1, 1]} : vector<8x128xf32> to vector<8x96xf32>
    %299 = arith.negf %298 : vector<8x96xf32>
    %300 = math.exp %299 : vector<8x96xf32>
    %cst_58 = arith.constant 1.000000e+00 : f32
    %301 = vector.broadcast %cst_58 : f32 to vector<8x96xf32>
    %302 = arith.addf %301, %300 : vector<8x96xf32>
    %303 = arith.divf %301, %302 : vector<8x96xf32>
    %304 = vector.extract_strided_slice %297 {offsets = [0, 96], sizes = [8, 32], strides = [1, 1]} : vector<8x128xf32> to vector<8x32xf32>
    %305 = math.tanh %304 : vector<8x32xf32>
    %306 = vector.extract_strided_slice %303 {offsets = [0, 0], sizes = [8, 32], strides = [1, 1]} : vector<8x96xf32> to vector<8x32xf32>
    %307 = vector.extract_strided_slice %303 {offsets = [0, 32], sizes = [8, 32], strides = [1, 1]} : vector<8x96xf32> to vector<8x32xf32>
    %308 = vector.extract_strided_slice %303 {offsets = [0, 64], sizes = [8, 32], strides = [1, 1]} : vector<8x96xf32> to vector<8x32xf32>
    %309 = arith.mulf %307, %269 : vector<8x32xf32>
    %310 = arith.mulf %306, %305 : vector<8x32xf32>
    %311 = arith.addf %309, %310 : vector<8x32xf32>
    %312 = math.tanh %311 : vector<8x32xf32>
    %313 = arith.mulf %308, %312 : vector<8x32xf32>
    %314 = vector.extract_strided_slice %11 {offsets = [56, 0], sizes = [8, 128], strides = [1, 1]} : vector<64x128xf32> to vector<8x128xf32>
    %315 = arith.truncf %291 : vector<8x32xf32> to vector<8x32xbf16>
    %cst_59 = arith.constant dense<0.000000e+00> : vector<8x128xf32>
    %316 = tpu.matmul %315, %2, %cst_59 {dimension_numbers = #tpu.dot_dimension_numbers<[1], [0], [0], [1], [0, 0, 1, 1], [], []>} : vector<8x32xbf16>, vector<32x128xbf16>, vector<8x128xf32> -> vector<8x128xf32>
    %317 = arith.addf %314, %316 : vector<8x128xf32>
    %318 = vector.extract_strided_slice %317 {offsets = [0, 0], sizes = [8, 96], strides = [1, 1]} : vector<8x128xf32> to vector<8x96xf32>
    %319 = arith.negf %318 : vector<8x96xf32>
    %320 = math.exp %319 : vector<8x96xf32>
    %cst_60 = arith.constant 1.000000e+00 : f32
    %321 = vector.broadcast %cst_60 : f32 to vector<8x96xf32>
    %322 = arith.addf %321, %320 : vector<8x96xf32>
    %323 = arith.divf %321, %322 : vector<8x96xf32>
    %324 = vector.extract_strided_slice %317 {offsets = [0, 96], sizes = [8, 32], strides = [1, 1]} : vector<8x128xf32> to vector<8x32xf32>
    %325 = math.tanh %324 : vector<8x32xf32>
    %326 = vector.extract_strided_slice %323 {offsets = [0, 0], sizes = [8, 32], strides = [1, 1]} : vector<8x96xf32> to vector<8x32xf32>
    %327 = vector.extract_strided_slice %323 {offsets = [0, 32], sizes = [8, 32], strides = [1, 1]} : vector<8x96xf32> to vector<8x32xf32>
    %328 = vector.extract_strided_slice %323 {offsets = [0, 64], sizes = [8, 32], strides = [1, 1]} : vector<8x96xf32> to vector<8x32xf32>
    %329 = arith.mulf %327, %289 : vector<8x32xf32>
    %330 = arith.mulf %326, %325 : vector<8x32xf32>
    %331 = arith.addf %329, %330 : vector<8x32xf32>
    %332 = math.tanh %331 : vector<8x32xf32>
    %333 = arith.mulf %328, %332 : vector<8x32xf32>
    %334 = arith.truncf %333 : vector<8x32xf32> to vector<8x32xbf16>
    %cst_61 = arith.constant dense<0.000000e+00> : vector<8x128xf32>
    %335 = tpu.matmul %334, %1, %cst_61 {dimension_numbers = #tpu.dot_dimension_numbers<[1], [0], [0], [1], [0, 0, 1, 1], [], []>} : vector<8x32xbf16>, vector<32x128xbf16>, vector<8x128xf32> -> vector<8x128xf32>
    %336 = arith.addf %335, %7 : vector<8x128xf32>
    %337 = arith.truncf %313 : vector<8x32xf32> to vector<8x32xbf16>
    %cst_62 = arith.constant dense<0.000000e+00> : vector<8x128xf32>
    %338 = tpu.matmul %337, %3, %cst_62 {dimension_numbers = #tpu.dot_dimension_numbers<[1], [0], [0], [1], [0, 0, 1, 1], [], []>} : vector<8x32xbf16>, vector<32x128xbf16>, vector<8x128xf32> -> vector<8x128xf32>
    %339 = arith.addf %336, %338 : vector<8x128xf32>
    %340 = vector.extract_strided_slice %339 {offsets = [0, 0], sizes = [8, 96], strides = [1, 1]} : vector<8x128xf32> to vector<8x96xf32>
    %341 = arith.negf %340 : vector<8x96xf32>
    %342 = math.exp %341 : vector<8x96xf32>
    %cst_63 = arith.constant 1.000000e+00 : f32
    %343 = vector.broadcast %cst_63 : f32 to vector<8x96xf32>
    %344 = arith.addf %343, %342 : vector<8x96xf32>
    %345 = arith.divf %343, %344 : vector<8x96xf32>
    %346 = vector.extract_strided_slice %339 {offsets = [0, 96], sizes = [8, 32], strides = [1, 1]} : vector<8x128xf32> to vector<8x32xf32>
    %347 = math.tanh %346 : vector<8x32xf32>
    %348 = vector.extract_strided_slice %345 {offsets = [0, 0], sizes = [8, 32], strides = [1, 1]} : vector<8x96xf32> to vector<8x32xf32>
    %349 = vector.extract_strided_slice %345 {offsets = [0, 32], sizes = [8, 32], strides = [1, 1]} : vector<8x96xf32> to vector<8x32xf32>
    %350 = vector.extract_strided_slice %345 {offsets = [0, 64], sizes = [8, 32], strides = [1, 1]} : vector<8x96xf32> to vector<8x32xf32>
    %351 = arith.mulf %349, %311 : vector<8x32xf32>
    %352 = arith.mulf %348, %347 : vector<8x32xf32>
    %353 = arith.addf %351, %352 : vector<8x32xf32>
    %354 = math.tanh %353 : vector<8x32xf32>
    %355 = arith.mulf %350, %354 : vector<8x32xf32>
    %c0_64 = arith.constant 0 : index
    %c0_65 = arith.constant 0 : index
    %c0_66 = arith.constant 0 : index
    %356 = vector.load %arg12[%c0_64, %c0_65, %c0_66] : memref<2x8x32xf32, #tpu.memory_space<vmem>>, vector<1x8x32xf32>
    %357 = vector.shape_cast %356 : vector<1x8x32xf32> to vector<8x32xf32>
    %358 = vector.shape_cast %333 : vector<8x32xf32> to vector<1x8x32xf32>
    tpu.vector_store %arg12[%c0_64, %c0_65, %c0_66], %358 {strides = array<i32>} : memref<2x8x32xf32, #tpu.memory_space<vmem>>, vector<1x8x32xf32>,
    %c0_67 = arith.constant 0 : index
    %c0_68 = arith.constant 0 : index
    %c0_69 = arith.constant 0 : index
    %359 = vector.load %arg13[%c0_67, %c0_68, %c0_69] : memref<2x8x32xf32, #tpu.memory_space<vmem>>, vector<1x8x32xf32>
    %360 = vector.shape_cast %359 : vector<1x8x32xf32> to vector<8x32xf32>
    %361 = vector.shape_cast %331 : vector<8x32xf32> to vector<1x8x32xf32>
    tpu.vector_store %arg13[%c0_67, %c0_68, %c0_69], %361 {strides = array<i32>} : memref<2x8x32xf32, #tpu.memory_space<vmem>>, vector<1x8x32xf32>,
    %c1_70 = arith.constant 1 : index
    %c0_71 = arith.constant 0 : index
    %c0_72 = arith.constant 0 : index
    %362 = vector.load %arg12[%c1_70, %c0_71, %c0_72] : memref<2x8x32xf32, #tpu.memory_space<vmem>>, vector<1x8x32xf32>
    %363 = vector.shape_cast %362 : vector<1x8x32xf32> to vector<8x32xf32>
    %364 = vector.shape_cast %355 : vector<8x32xf32> to vector<1x8x32xf32>
    tpu.vector_store %arg12[%c1_70, %c0_71, %c0_72], %364 {strides = array<i32>} : memref<2x8x32xf32, #tpu.memory_space<vmem>>, vector<1x8x32xf32>,
    %c1_73 = arith.constant 1 : index
    %c0_74 = arith.constant 0 : index
    %c0_75 = arith.constant 0 : index
    %365 = vector.load %arg13[%c1_73, %c0_74, %c0_75] : memref<2x8x32xf32, #tpu.memory_space<vmem>>, vector<1x8x32xf32>
    %366 = vector.shape_cast %365 : vector<1x8x32xf32> to vector<8x32xf32>
    %367 = vector.shape_cast %353 : vector<8x32xf32> to vector<1x8x32xf32>
    tpu.vector_store %arg13[%c1_73, %c0_74, %c0_75], %367 {strides = array<i32>} : memref<2x8x32xf32, #tpu.memory_space<vmem>>, vector<1x8x32xf32>,
    %c0_76 = arith.constant 0 : index
    %c0_77 = arith.constant 0 : index
    %368 = vector.load %arg9[%c0_76, %c0_77] : memref<32x1xf32, #tpu.memory_space<vmem>>, vector<32x1xf32>
    %cst_78 = arith.constant dense<0.000000e+00> : vector<8x1xf32>
    %369 = tpu.matmul %355, %368, %cst_78 {dimension_numbers = #tpu.dot_dimension_numbers<[1], [0], [0], [1], [0, 0, 1, 1], [], []>} : vector<8x32xf32>, vector<32x1xf32>, vector<8x1xf32> -> vector<8x1xf32>
    %c0_79 = arith.constant 0 : index
    %c0_80 = arith.constant 0 : index
    %370 = vector.load %arg10[%c0_79, %c0_80] : memref<1x1xf32, #tpu.memory_space<vmem>>, vector<1x1xf32>
    %371 = vector.broadcast %370 : vector<1x1xf32> to vector<8x1xf32>
    %372 = arith.addf %369, %371 : vector<8x1xf32>
    %373 = arith.negf %372 : vector<8x1xf32>
    %374 = math.exp %373 : vector<8x1xf32>
    %cst_81 = arith.constant 1.000000e+00 : f32
    %375 = vector.broadcast %cst_81 : f32 to vector<8x1xf32>
    %376 = arith.addf %375, %374 : vector<8x1xf32>
    %377 = arith.divf %375, %376 : vector<8x1xf32>
    %c0_82 = arith.constant 0 : index
    %c0_83 = arith.constant 0 : index
    %378 = vector.load %arg11[%c0_82, %c0_83] : memref<8x1xf32, #tpu.memory_space<vmem>>, vector<8x1xf32>
    tpu.vector_store %arg11[%c0_82, %c0_83], %377 {strides = array<i32>} : memref<8x1xf32, #tpu.memory_space<vmem>>, vector<8x1xf32>,
    return
  }
}

</mosaic_0001>

<bundles_post_ra>
// kernel: lstm_analyzer_forward.1
= control target key start
LH: loop header
LB: loop body
LE: loop exit
PB: predicated region body
PF: predicated region fallthrough
CT: control target
= control target key end

     0   :  { %v2348_v0 = vmov 0.0   ;;  %vm2349_vm0 = vmmov 0   ;;  %vm106_vm1 = vcmask 130048   ;;  %vm203_vm2 = vcmask 261120   ;;  %s2350_s21 = smov 32   ;;  %s2351_s18 = smov 64   ;;  %s2879_s1 = inlined_call_operand.vmem [shape: bf16[16,128], index: 1, kind: input, shape index: {}]   ;;  %s2880_s2 = inlined_call_operand.vmem [shape: bf16[32,128], index: 2, kind: input, shape index: {}]   ;;  %s2881_s0 = inlined_call_operand.vmem [shape: bf16[64,16], index: 0, kind: input, shape index: {}]   ;;  %s2882_s7 = inlined_call_operand.vmem [shape: f32[2,8,32], index: 7, kind: input, shape index: {}]   ;;  %s2883_s3 = inlined_call_operand.vmem [shape: f32[1,128], index: 3, kind: input, shape index: {}]   ;;  %s2884_s8 = inlined_call_operand.vmem [shape: f32[2,8,32], index: 8, kind: input, shape index: {}]   ;;  %s2885_s4 = inlined_call_operand.vmem [shape: bf16[32,128], index: 4, kind: input, shape index: {}]   ;;  %s2886_s5 = inlined_call_operand.vmem [shape: bf16[32,128], index: 5, kind: input, shape index: {}]   ;;  %s2887_s6 = inlined_call_operand.vmem [shape: f32[1,128], index: 6, kind: input, shape index: {}]   ;;  %s2888_s9 = inlined_call_operand.vmem [shape: f32[32,1], index: 9, kind: input, shape index: {}]   ;;  %s2889_s10 = inlined_call_operand.<no memory space> [shape: f32[1,1], index: 10, kind: input, shape index: {}]   ;;  %s2890_s12 = inlined_call_operand.vmem [shape: f32[2,8,32], index: 12, kind: output, shape index: {1}]   ;;  %s2891_s13 = inlined_call_operand.vmem [shape: f32[2,8,32], index: 13, kind: output, shape index: {2}]   ;;  %s2892_s11 = inlined_call_operand.vmem [shape: f32[8,1], index: 11, kind: output, shape index: {0}]  }
   0x1   :  { %1989 = vmatprep.subr.bf16.mxu1 %v2348_v0  ;;  %v2197_v1 = vld [vmem:[%s2879_s1] sm:$0xff]   ;;  %1993 = vmatprep.mubr.msk.bf16.mxu1 %vm2349_vm0, %v2348_v0  ;;  %v2432_v2 = vld [vmem:[%s2880_s2 + $0x8] sm:$0xff]   ;;  %v2203_v29 = vld [vmem:[%s2881_s0 + $0x10] sm:$0xff]   ;;  %vm1819_vm3 = vcmask 7168  }
   0x2   :  { %1979 = vmatprep.subr.bf16.mxu0 %v2197_v1  ;;  %v2199_v3 = vld [vmem:[%s2881_s0] sm:$0xff]   ;;  %1990 = vmatpush3.bf16.msra.mxu1 %v2432_v2  ;;  %v2200_v4 = vld [vmem:[%s2881_s0 + $0x8] sm:$0xff]   ;;  %v2204_v30 = vld [vmem:[%s2881_s0 + $0x18] sm:$0xff]  }
   0x3   :  { %1980 = vmatpush3.bf16.msra.mxu0 %v2197_v1  ;;  %1981 = vmatprep.mubr.msk.bf16.mxu0 %vm106_vm1, %v2199_v3  ;;  %v2446_v5 = vld [vmem:[%s2880_s2] sm:$0xff]   ;;  %v2484_v31 = vld [vmem:[%s2885_s4 + $0x8] sm:$0xff]  }
   0x4   :  { %1991 = vmatprep.subr.bf16.mxu1 %v2348_v0  ;;  %v184_v6 = vld [vmem:[%s2882_s7] sm:$0xff]  ;;  %2005 = vmatprep.subr.bf16.mxu0 %v2348_v0  ;;  %v1844_v32 = vld [vmem:[%s2882_s7 + $0x8] sm:$0xff] }
   0x5   :  { %v190_v7 = vpack.c.bf16 %v184_v6, %v184_v6  ;;  %v2463_v9 = vld [vmem:[%s2883_s3] ss:$0 sm:$0xff]  ;;  %v2493_v33 = vld [vmem:[%s2886_s5 + $0x8] sm:$0xff]   ;;  %v335_v36 = vpack.c.bf16 %v1844_v32, %v1844_v32 }
   0x6   :  { %1982 = vmatmul.mubr.msk.bf16.vlgmr.msra.gmra.mxu0 %vm106_vm1, %v2200_v4  ;;  %1992 = vmatpush3.bf16.msra.mxu1 %v2446_v5  ;;  %v187_v18 = vld [vmem:[%s2884_s8] sm:$0xff]  ;;  %v1845_v4 = vld [vmem:[%s2884_s8 + $0x8] sm:$0xff]  ;;  %s2352_s8 = smov 96  }
   0x7   :  { %1997 = vmatprep.subr.bf16.mxu1 %v2348_v0  ;;  %1985 = vmatprep.mubr.msk.bf16.mxu0 %vm106_vm1, %v2203_v29  ;;  %v2500_v34 = vld [vmem:[%s2885_s4] sm:$0xff]  }
   0x8   :  { %2006 = vmatpush3.bf16.msra.mxu0 %v2493_v33  ;;  %v2507_v35 = vld [vmem:[%s2886_s5] sm:$0xff]  }
   0x9   :  { %1994 = vmatmul.mubr.msk.bf16.vlgmr.msra.gmra.mxu1 %vm203_vm2, %v190_v7  ;;  %2007 = vmatprep.subr.bf16.mxu0 %v2348_v0  ;;  %v2552_v52 = vld [vmem:[%s2887_s6] ss:$0 sm:$0xff] }
   0xa   :  { %2001 = vmatprep.mubr.msk.bf16.mxu1 %vm2349_vm0, %v2348_v0  ;;  %1998 = vmatpush3.bf16.msra.mxu1 %v2484_v31 }
   0xb   :  { %1999 = vmatprep.subr.bf16.mxu1 %v2348_v0 }
   0xc   :  { %2008 = vmatpush3.bf16.msra.mxu0 %v2507_v35 }
   0xd   :  { %2021 = vmatprep.subr.bf16.mxu0 %v2348_v0 }
   0xe   :  { %1986 = vmatmul.mubr.msk.bf16.gmra.mxu0 %vm106_vm1, %v2204_v30  ;;  %2000 = vmatpush3.bf16.msra.mxu1 %v2500_v34 }
   0xf   :  { %2009 = vmatprep.mubr.msk.bf16.mxu0 %vm2349_vm0, %v2348_v0  ;;  %2013 = vmatprep.subr.bf16.mxu1 %v2348_v0 }
  0x16   :  { %2010 = vmatmul.mubr.msk.bf16.vlgmr.msra.gmra.mxu0 %vm203_vm2, %v335_v36 }
  0x17   :  { %2022 = vmatpush3.bf16.msra.mxu0 %v2484_v31  ;;  %2025 = vmatprep.mubr.msk.bf16.mxu0 %vm2349_vm0, %v2348_v0 }
  0x18   :  { %2023 = vmatprep.subr.bf16.mxu0 %v2348_v0 }
  0x1b   :  { %2024 = vmatpush3.bf16.msra.mxu0 %v2500_v34 }
  0x1c   :  { %2037 = vmatprep.subr.bf16.mxu0 %v2348_v0 }
  0xc6   :  { %v2458_v8 = vpop.f32.mrf.mxu0 }
  0xc8   :  { %v153_v10 = vpop.f32.mrf.mxu0 }
  0xc9   :  { %v154_v11 = vadd.f32 %v2463_v9, %v153_v10  ;;  %v241_v12 = vpop.f32.mrf.mxu1 }
  0xca   :  { %v2539_v42 = vpop.f32.mrf.mxu0 }
  0xcb   :  { %v247_v13 = vadd.f32 %v241_v12, %v154_v11  ;;  %v1995_v14 = vpop.f32.mrf.mxu1 }
  0xcc   :  { %v156_v43 = vpop.f32.mrf.mxu0 }
  0xcd   :  { %2208 = vtanh.f32 %v247_v13  ;;  %v244_v15 = vpop.f32.mrf.mxu1  ;;  %v1849_v19 = vmul.f32 -1.442695, %v247_v13  ;;  %v157_v59 = vadd.f32 %v2463_v9, %v156_v43 }
  0xce   :  { %v2541_v44 = vpop.f32.mrf.mxu0 }
  0xcf   :  { %v1996_v16 = vpop.f32.mrf.mxu1  ;;  %2210 = vpow2.f32 %v1849_v19 }
  0xd0   :  { %v2543_v45 = vpop.f32.mrf.mxu0 }
  0xd2   :  { %v2545_v46 = vpop.f32.mrf.mxu0 }
  0xd4   :  { %v2547_v47 = vpop.f32.mrf.mxu0 }
  0xd6   :  { %v385_v48 = vpop.f32.mrf.mxu0 }
  0xd8   :  { %v2011_v49 = vpop.f32.mrf.mxu0 }
  0xda   :  { %v2209_v17 = vpop.eup %2208  ;;  %v388_v50 = vpop.f32.mrf.mxu0 }
  0xdb   :  { %261 = vrot.lane.b32.xlu0 %v2209_v17, %s2350_s21 }
  0xdc   :  { %v2211_v20 = vpop.eup %2210  ;;  %v2012_v51 = vpop.f32.mrf.mxu0 }
  0xdd   :  { %v251_v21 = vadd.f32 1.0, %v2211_v20 }
  0xdf   :  { %256 = vrot.lane.b32.xlu0 %v187_v18, %s2350_s21  ;;  %2212 = vrcp.f32 %v251_v21 }
  0xec   :  { %v2213_v22 = vpop.eup %2212 }
 0x14d   :  { %v262_v23 = vpop.permute.xlu0 %261 }
 0x14e   :  { %v264_v24 = vmul.f32 %v2213_v22, %v262_v23 }
 0x150   :  { %266 = vrot.lane.b32.xlu1 %v264_v24, %s2350_s21 }
 0x151   :  { %v257_v25 = vpop.permute.xlu0 %256 }
 0x152   :  { %v259_v26 = vmul.f32 %v2213_v22, %v257_v25 }
 0x1c2   :  { %v267_v27 = vpop.permute.xlu1 %266 }
 0x1c3   :  { %v2472_v28 = vadd.f32 %v267_v27, %v259_v26 }
 0x1c5   :  { %2214 = vtanh.f32 %v2472_v28 }
 0x1d2   :  { %v2215_v37 = vpop.eup %2214 }
 0x1d3   :  { %272 = vrot.lane.b32.xlu1 %v2215_v37, %s2350_s21 }
 0x245   :  { %v273_v38 = vpop.permute.xlu1 %272 }
 0x246   :  { %v275_v39 = vmul.f32 %v2213_v22, %v273_v38 }
 0x248   :  { %v276_v40 = vpack.c.bf16 %v275_v39, %v275_v39 }
 0x24a   :  { %278 = vrot.lane.b32.xlu0 %v276_v40, %s2351_s18 }
 0x2bc   :  { %v279_v41 = vpop.permute.xlu0 %278 }
 0x2bd   :  { %2002 = vmatmul.mubr.msk.bf16.vlgmr.msra.gmra.mxu1 %vm203_vm2, %v279_v41 }
 0x2be   :  { %2014 = vmatpush3.bf16.msra.mxu1 %v2432_v2  ;;  %2017 = vmatprep.mubr.msk.bf16.mxu1 %vm2349_vm0, %v2348_v0 }
 0x2bf   :  { %2015 = vmatprep.subr.bf16.mxu1 %v2348_v0 }
 0x2c2   :  { %2016 = vmatpush3.bf16.msra.mxu1 %v2446_v5 }
 0x2c3   :  { %2029 = vmatprep.subr.bf16.mxu1 %v2348_v0 }
 0x2c5   :  { %2018 = vmatmul.mubr.msk.bf16.vlgmr.msra.gmra.mxu1 %vm203_vm2, %v279_v41 }
 0x2c6   :  { %2030 = vmatpush3.bf16.msra.mxu1 %v2493_v33  ;;  %2033 = vmatprep.mubr.msk.bf16.mxu1 %vm2349_vm0, %v2348_v0 }
 0x2c7   :  { %2031 = vmatprep.subr.bf16.mxu1 %v2348_v0 }
 0x2ca   :  { %2032 = vmatpush3.bf16.msra.mxu1 %v2507_v35 }
 0x2cb   :  { %2045 = vmatprep.subr.bf16.mxu1 %v2348_v0 }
 0x37d   :  { %v329_v53 = vpop.f32.mrf.mxu1 }
 0x37e   :  { %v330_v54 = vadd.f32 %v2552_v52, %v329_v53 }
 0x37f   :  { %v2003_v55 = vpop.f32.mrf.mxu1 }
 0x380   :  { %v391_v56 = vadd.f32 %v385_v48, %v330_v54 }
 0x381   :  { %v332_v57 = vpop.f32.mrf.mxu1 }
 0x382   :  { %2216 = vtanh.f32 %v391_v56  ;;  %v1856_v10 = vmul.f32 -1.442695, %v391_v56  ;;  %v162_v56 = vadd.f32 %v2458_v8, %v2463_v9 }
 0x383   :  { %v2004_v58 = vpop.f32.mrf.mxu1 }
 0x385   :  { %v454_v60 = vpop.f32.mrf.mxu1 }
 0x386   :  { %v460_v61 = vadd.f32 %v454_v60, %v157_v59 }
 0x387   :  { %v2019_v62 = vpop.f32.mrf.mxu1 }
 0x388   :  { %2218 = vtanh.f32 %v460_v61  ;;  %v1858_v7 = vmul.f32 -1.442695, %v460_v61 }
 0x389   :  { %v457_v63 = vpop.f32.mrf.mxu1 }
 0x38a   :  { %2220 = vpow2.f32 %v1858_v7 }
 0x38b   :  { %v2020_v1 = vpop.f32.mrf.mxu1  ;;  %2222 = vpow2.f32 %v1856_v10 }
 0x38f   :  { %v2217_v3 = vpop.eup %2216 }
 0x390   :  { %405 = vrot.lane.b32.xlu0 %v2217_v3, %s2350_s21 }
 0x394   :  { %400 = vrot.lane.b32.xlu0 %v1845_v4, %s2350_s21 }
 0x395   :  { %v2219_v6 = vpop.eup %2218 }
 0x396   :  { %470 = vrot.lane.b32.xlu1 %v2219_v6, %s2350_s21 }
 0x397   :  { %v2221_v11 = vpop.eup %2220 }
 0x398   :  { %v464_v12 = vadd.f32 1.0, %v2221_v11  ;;  %v2223_v13 = vpop.eup %2222 }
 0x399   :  { %v395_v14 = vadd.f32 1.0, %v2223_v13 }
 0x39a   :  { %2224 = vrcp.f32 %v464_v12 }
 0x39b   :  { %2226 = vrcp.f32 %v395_v14 }
 0x3a7   :  { %v2225_v15 = vpop.eup %2224 }
 0x3a8   :  { %v2227_v19 = vpop.eup %2226  ;;  %v468_v21 = vmul.f32 %v2225_v15, %v2472_v28 }
 0x402   :  { %v406_v18 = vpop.permute.xlu0 %405 }
 0x403   :  { %v408_v20 = vmul.f32 %v2227_v19, %v406_v18 }
 0x406   :  { %v401_v22 = vpop.permute.xlu0 %400 }
 0x407   :  { %v403_v25 = vmul.f32 %v2227_v19, %v401_v22 }
 0x408   :  { %v471_v16 = vpop.permute.xlu1 %470 }
 0x409   :  { %v473_v17 = vmul.f32 %v2225_v15, %v471_v16 }
 0x40b   :  { %475 = vrot.lane.b32.xlu1 %v473_v17, %s2350_s21 }
 0x40f   :  { %410 = vrot.lane.b32.xlu1 %v408_v20, %s2350_s21 }
 0x47d   :  { %v476_v23 = vpop.permute.xlu1 %475 }
 0x47e   :  { %v2565_v24 = vadd.f32 %v476_v23, %v468_v21 }
 0x480   :  { %2228 = vtanh.f32 %v2565_v24 }
 0x481   :  { %v411_v26 = vpop.permute.xlu1 %410 }
 0x482   :  { %v2568_v27 = vadd.f32 %v411_v26, %v403_v25 }
 0x484   :  { %2230 = vtanh.f32 %v2568_v27 }
 0x48d   :  { %v2229_v29 = vpop.eup %2228 }
 0x48e   :  { %481 = vrot.lane.b32.xlu0 %v2229_v29, %s2350_s21 }
 0x491   :  { %v2231_v30 = vpop.eup %2230 }
 0x492   :  { %416 = vrot.lane.b32.xlu1 %v2231_v30, %s2350_s21 }
 0x500   :  { %v482_v32 = vpop.permute.xlu0 %481 }
 0x501   :  { %v484_v28 = vmul.f32 %v2225_v15, %v482_v32 }
 0x503   :  { %v485_v36 = vpack.c.bf16 %v484_v28, %v484_v28 }
 0x504   :  { %v417_v37 = vpop.permute.xlu1 %416 }
 0x505   :  { %v419_v38 = vmul.f32 %v2227_v19, %v417_v37  ;;  %487 = vrot.lane.b32.xlu0 %v485_v36, %s2351_s18 }
 0x507   :  { %v532_v39 = vpack.c.bf16 %v419_v38, %v419_v38 }
 0x509   :  { %534 = vrot.lane.b32.xlu1 %v532_v39, %s2351_s18 }
 0x577   :  { %v488_v40 = vpop.permute.xlu0 %487 }
 0x578   :  { %2026 = vmatmul.mubr.msk.bf16.vlgmr.msra.gmra.mxu0 %vm203_vm2, %v488_v40 }
 0x579   :  { %2038 = vmatpush3.bf16.msra.mxu0 %v2432_v2  ;;  %2041 = vmatprep.mubr.msk.bf16.mxu0 %vm2349_vm0, %v2348_v0 }
 0x57a   :  { %2039 = vmatprep.subr.bf16.mxu0 %v2348_v0 }
 0x57b   :  { %v535_v41 = vpop.permute.xlu1 %534 }
 0x57c   :  { %2034 = vmatmul.mubr.msk.bf16.vlgmr.msra.gmra.mxu1 %vm203_vm2, %v535_v41 }
 0x57d   :  { %2040 = vmatpush3.bf16.msra.mxu0 %v2446_v5  ;;  %2046 = vmatpush3.bf16.msra.mxu1 %v2484_v31 }
 0x57e   :  { %2053 = vmatprep.subr.bf16.mxu0 %v2348_v0  ;;  %2047 = vmatprep.subr.bf16.mxu1 %v2348_v0 }
 0x57f   :  { %2049 = vmatprep.mubr.msk.bf16.mxu1 %vm2349_vm0, %v2348_v0 }
 0x580   :  { %2042 = vmatmul.mubr.msk.bf16.vlgmr.msra.gmra.mxu0 %vm203_vm2, %v488_v40 }
 0x581   :  { %2054 = vmatpush3.bf16.msra.mxu0 %v2493_v33  ;;  %2057 = vmatprep.mubr.msk.bf16.mxu0 %vm2349_vm0, %v2348_v0 }
 0x582   :  { %2055 = vmatprep.subr.bf16.mxu0 %v2348_v0  ;;  %2048 = vmatpush3.bf16.msra.mxu1 %v2500_v34 }
 0x583   :  { %2061 = vmatprep.subr.bf16.mxu1 %v2348_v0 }
 0x585   :  { %2056 = vmatpush3.bf16.msra.mxu0 %v2507_v35 }
 0x586   :  { %2069 = vmatprep.subr.bf16.mxu0 %v2348_v0 }
 0x638   :  { %v526_v43 = vpop.f32.mrf.mxu0 }
 0x639   :  { %v527_v49 = vadd.f32 %v2552_v52, %v526_v43 }
 0x63a   :  { %v2027_v48 = vpop.f32.mrf.mxu0 }
 0x63c   :  { %v529_v50 = vpop.f32.mrf.mxu0  ;;  %v573_v51 = vpop.f32.mrf.mxu1 }
 0x63d   :  { %v579_v53 = vadd.f32 %v573_v51, %v527_v49 }
 0x63e   :  { %v2028_v54 = vpop.f32.mrf.mxu0  ;;  %v2035_v55 = vpop.f32.mrf.mxu1 }
 0x63f   :  { %2232 = vtanh.f32 %v579_v53  ;;  %v1861_v4 = vmul.f32 -1.442695, %v579_v53  ;;  %v165_v54 = vadd.f32 %v2539_v42, %v2463_v9 }
 0x640   :  { %v576_v57 = vpop.f32.mrf.mxu1  ;;  %v638_v58 = vpop.f32.mrf.mxu0 }
 0x641   :  { %v644_v59 = vadd.f32 %v638_v58, %v162_v56 }
 0x642   :  { %v2036_v60 = vpop.f32.mrf.mxu1  ;;  %v2043_v61 = vpop.f32.mrf.mxu0 }
 0x643   :  { %2234 = vtanh.f32 %v644_v59  ;;  %v1863_v6 = vmul.f32 -1.442695, %v644_v59 }
 0x644   :  { %v641_v62 = vpop.f32.mrf.mxu0  ;;  %2236 = vpow2.f32 %v1861_v4 }
 0x645   :  { %2238 = vpow2.f32 %v1863_v6 }
 0x646   :  { %v2044_v63 = vpop.f32.mrf.mxu0 }
 0x64c   :  { %v2233_v1 = vpop.eup %2232 }
 0x64d   :  { %589 = vrot.lane.b32.xlu1 %v2233_v1, %s2350_s21 }
 0x650   :  { %v2235_v3 = vpop.eup %2234 }
 0x651   :  { %654 = vrot.lane.b32.xlu0 %v2235_v3, %s2350_s21  ;;  %v2237_v8 = vpop.eup %2236 }
 0x652   :  { %v583_v7 = vadd.f32 1.0, %v2237_v8  ;;  %v2239_v10 = vpop.eup %2238 }
 0x653   :  { %v648_v11 = vadd.f32 1.0, %v2239_v10 }
 0x654   :  { %2240 = vrcp.f32 %v583_v7 }
 0x655   :  { %2242 = vrcp.f32 %v648_v11 }
 0x661   :  { %v2241_v12 = vpop.eup %2240 }
 0x662   :  { %v2243_v15 = vpop.eup %2242  ;;  %v587_v18 = vmul.f32 %v2241_v12, %v2568_v27 }
 0x663   :  { %v652_v21 = vmul.f32 %v2243_v15, %v2565_v24 }
 0x6bf   :  { %v590_v13 = vpop.permute.xlu1 %589 }
 0x6c0   :  { %v592_v14 = vmul.f32 %v2241_v12, %v590_v13 }
 0x6c2   :  { %594 = vrot.lane.b32.xlu1 %v592_v14, %s2350_s21 }
 0x6c3   :  { %v655_v16 = vpop.permute.xlu0 %654 }
 0x6c4   :  { %v657_v17 = vmul.f32 %v2243_v15, %v655_v16 }
 0x6c6   :  { %659 = vrot.lane.b32.xlu0 %v657_v17, %s2350_s21 }
 0x734   :  { %v595_v19 = vpop.permute.xlu1 %594 }
 0x735   :  { %v2604_v20 = vadd.f32 %v595_v19, %v587_v18 }
 0x737   :  { %2244 = vtanh.f32 %v2604_v20 }
 0x738   :  { %v660_v22 = vpop.permute.xlu0 %659 }
 0x739   :  { %v2608_v23 = vadd.f32 %v660_v22, %v652_v21 }
 0x73b   :  { %2246 = vtanh.f32 %v2608_v23 }
 0x744   :  { %v2245_v25 = vpop.eup %2244 }
 0x745   :  { %600 = vrot.lane.b32.xlu1 %v2245_v25, %s2350_s21 }
 0x748   :  { %v2247_v26 = vpop.eup %2246 }
 0x749   :  { %665 = vrot.lane.b32.xlu0 %v2247_v26, %s2350_s21 }
 0x7b7   :  { %v601_v29 = vpop.permute.xlu1 %600 }
 0x7b8   :  { %v603_v27 = vmul.f32 %v2241_v12, %v601_v29 }
 0x7ba   :  { %v716_v30 = vpack.c.bf16 %v603_v27, %v603_v27 }
 0x7bb   :  { %v666_v32 = vpop.permute.xlu0 %665 }
 0x7bc   :  { %v668_v28 = vmul.f32 %v2243_v15, %v666_v32  ;;  %718 = vrot.lane.b32.xlu1 %v716_v30, %s2351_s18 }
 0x7be   :  { %v669_v36 = vpack.c.bf16 %v668_v28, %v668_v28 }
 0x7c0   :  { %671 = vrot.lane.b32.xlu0 %v669_v36, %s2351_s18 }
 0x82e   :  { %v719_v24 = vpop.permute.xlu1 %718 }
 0x82f   :  { %2058 = vmatmul.mubr.msk.bf16.vlgmr.msra.gmra.mxu0 %vm203_vm2, %v719_v24 }
 0x830   :  { %2070 = vmatpush3.bf16.msra.mxu0 %v2484_v31  ;;  %2073 = vmatprep.mubr.msk.bf16.mxu0 %vm2349_vm0, %v2348_v0 }
 0x831   :  { %2071 = vmatprep.subr.bf16.mxu0 %v2348_v0 }
 0x832   :  { %v672_v37 = vpop.permute.xlu0 %671 }
 0x833   :  { %2050 = vmatmul.mubr.msk.bf16.vlgmr.msra.gmra.mxu1 %vm203_vm2, %v672_v37 }
 0x834   :  { %2062 = vmatpush3.bf16.msra.mxu1 %v2432_v2  ;;  %2065 = vmatprep.mubr.msk.bf16.mxu1 %vm2349_vm0, %v2348_v0 }
 0x835   :  { %2063 = vmatprep.subr.bf16.mxu1 %v2348_v0  ;;  %2072 = vmatpush3.bf16.msra.mxu0 %v2500_v34 }
 0x836   :  { %2085 = vmatprep.subr.bf16.mxu0 %v2348_v0 }
 0x838   :  { %2064 = vmatpush3.bf16.msra.mxu1 %v2446_v5 }
 0x839   :  { %2077 = vmatprep.subr.bf16.mxu1 %v2348_v0 }
 0x83b   :  { %2066 = vmatmul.mubr.msk.bf16.vlgmr.msra.gmra.mxu1 %vm203_vm2, %v672_v37 }
 0x83c   :  { %2078 = vmatpush3.bf16.msra.mxu1 %v2493_v33  ;;  %2081 = vmatprep.mubr.msk.bf16.mxu1 %vm2349_vm0, %v2348_v0 }
 0x83d   :  { %2079 = vmatprep.subr.bf16.mxu1 %v2348_v0 }
 0x840   :  { %2080 = vmatpush3.bf16.msra.mxu1 %v2507_v35 }
 0x841   :  { %2093 = vmatprep.subr.bf16.mxu1 %v2348_v0 }
 0x8ef   :  { %v757_v38 = vpop.f32.mrf.mxu0 }
 0x8f1   :  { %v2059_v39 = vpop.f32.mrf.mxu0 }
 0x8f3   :  { %v710_v40 = vpop.f32.mrf.mxu1  ;;  %v760_v41 = vpop.f32.mrf.mxu0 }
 0x8f4   :  { %v711_v43 = vadd.f32 %v2552_v52, %v710_v40 }
 0x8f5   :  { %v2051_v48 = vpop.f32.mrf.mxu1  ;;  %v2060_v49 = vpop.f32.mrf.mxu0 }
 0x8f6   :  { %v763_v50 = vadd.f32 %v757_v38, %v711_v43  ;;  %v170_v48 = vadd.f32 %v2463_v9, %v2543_v45 }
 0x8f7   :  { %v713_v51 = vpop.f32.mrf.mxu1 }
 0x8f8   :  { %2248 = vtanh.f32 %v763_v50  ;;  %v1866_v62 = vmul.f32 -1.442695, %v763_v50 }
 0x8f9   :  { %v2052_v53 = vpop.f32.mrf.mxu1 }
 0x8fb   :  { %v822_v55 = vpop.f32.mrf.mxu1 }
 0x8fc   :  { %v828_v56 = vadd.f32 %v822_v55, %v165_v54 }
 0x8fd   :  { %v2067_v57 = vpop.f32.mrf.mxu1 }
 0x8fe   :  { %2250 = vtanh.f32 %v828_v56  ;;  %v1868_v63 = vmul.f32 -1.442695, %v828_v56 }
 0x8ff   :  { %v825_v58 = vpop.f32.mrf.mxu1  ;;  %2252 = vpow2.f32 %v1866_v62 }
 0x900   :  { %2254 = vpow2.f32 %v1868_v63 }
 0x901   :  { %v2068_v59 = vpop.f32.mrf.mxu1 }
 0x905   :  { %v2249_v60 = vpop.eup %2248 }
 0x906   :  { %773 = vrot.lane.b32.xlu1 %v2249_v60, %s2350_s21 }
 0x90b   :  { %v2251_v61 = vpop.eup %2250 }
 0x90c   :  { %838 = vrot.lane.b32.xlu0 %v2251_v61, %s2350_s21  ;;  %v2253_v1 = vpop.eup %2252 }
 0x90d   :  { %v767_v3 = vadd.f32 1.0, %v2253_v1  ;;  %v2255_v4 = vpop.eup %2254 }
 0x90e   :  { %v832_v42 = vadd.f32 1.0, %v2255_v4 }
 0x90f   :  { %2256 = vrcp.f32 %v767_v3 }
 0x910   :  { %2258 = vrcp.f32 %v832_v42 }
 0x91c   :  { %v2257_v6 = vpop.eup %2256 }
 0x91d   :  { %v2259_v10 = vpop.eup %2258  ;;  %v771_v13 = vmul.f32 %v2257_v6, %v2604_v20 }
 0x91e   :  { %v836_v16 = vmul.f32 %v2259_v10, %v2608_v23 }
 0x978   :  { %v774_v8 = vpop.permute.xlu1 %773 }
 0x979   :  { %v776_v7 = vmul.f32 %v2257_v6, %v774_v8 }
 0x97b   :  { %778 = vrot.lane.b32.xlu1 %v776_v7, %s2350_s21 }
 0x97e   :  { %v839_v11 = vpop.permute.xlu0 %838 }
 0x97f   :  { %v841_v12 = vmul.f32 %v2259_v10, %v839_v11 }
 0x981   :  { %843 = vrot.lane.b32.xlu0 %v841_v12, %s2350_s21 }
 0x9ed   :  { %v779_v14 = vpop.permute.xlu1 %778 }
 0x9ee   :  { %v2644_v15 = vadd.f32 %v779_v14, %v771_v13 }
 0x9f0   :  { %2260 = vtanh.f32 %v2644_v15 }
 0x9f3   :  { %v844_v17 = vpop.permute.xlu0 %843 }
 0x9f4   :  { %v2648_v18 = vadd.f32 %v844_v17, %v836_v16 }
 0x9f6   :  { %2262 = vtanh.f32 %v2648_v18 }
 0x9fd   :  { %v2261_v19 = vpop.eup %2260 }
 0x9fe   :  { %784 = vrot.lane.b32.xlu1 %v2261_v19, %s2350_s21 }
 0xa03   :  { %v2263_v21 = vpop.eup %2262 }
 0xa04   :  { %849 = vrot.lane.b32.xlu0 %v2263_v21, %s2350_s21 }
 0xa70   :  { %v785_v22 = vpop.permute.xlu1 %784 }
 0xa71   :  { %v787_v20 = vmul.f32 %v2257_v6, %v785_v22 }
 0xa73   :  { %v900_v25 = vpack.c.bf16 %v787_v20, %v787_v20 }
 0xa75   :  { %902 = vrot.lane.b32.xlu1 %v900_v25, %s2351_s18 }
 0xa76   :  { %v850_v26 = vpop.permute.xlu0 %849 }
 0xa77   :  { %v852_v29 = vmul.f32 %v2259_v10, %v850_v26 }
 0xa79   :  { %v853_v27 = vpack.c.bf16 %v852_v29, %v852_v29 }
 0xa7b   :  { %855 = vrot.lane.b32.xlu0 %v853_v27, %s2351_s18 }
 0xae7   :  { %v903_v23 = vpop.permute.xlu1 %902 }
 0xae8   :  { %2082 = vmatmul.mubr.msk.bf16.vlgmr.msra.gmra.mxu1 %vm203_vm2, %v903_v23 }
 0xae9   :  { %2094 = vmatpush3.bf16.msra.mxu1 %v2484_v31  ;;  %2097 = vmatprep.mubr.msk.bf16.mxu1 %vm2349_vm0, %v2348_v0 }
 0xaea   :  { %2095 = vmatprep.subr.bf16.mxu1 %v2348_v0 }
 0xaed   :  { %v856_v30 = vpop.permute.xlu0 %855  ;;  %2096 = vmatpush3.bf16.msra.mxu1 %v2500_v34 }
 0xaee   :  { %2074 = vmatmul.mubr.msk.bf16.vlgmr.msra.gmra.mxu0 %vm203_vm2, %v856_v30  ;;  %2109 = vmatprep.subr.bf16.mxu1 %v2348_v0 }
 0xaef   :  { %2086 = vmatpush3.bf16.msra.mxu0 %v2432_v2  ;;  %2089 = vmatprep.mubr.msk.bf16.mxu0 %vm2349_vm0, %v2348_v0 }
 0xaf0   :  { %2087 = vmatprep.subr.bf16.mxu0 %v2348_v0 }
 0xaf3   :  { %2088 = vmatpush3.bf16.msra.mxu0 %v2446_v5 }
 0xaf4   :  { %2101 = vmatprep.subr.bf16.mxu0 %v2348_v0 }
 0xaf6   :  { %2090 = vmatmul.mubr.msk.bf16.vlgmr.msra.gmra.mxu0 %vm203_vm2, %v856_v30 }
 0xaf7   :  { %2102 = vmatpush3.bf16.msra.mxu0 %v2493_v33  ;;  %2105 = vmatprep.mubr.msk.bf16.mxu0 %vm2349_vm0, %v2348_v0 }
 0xaf8   :  { %2103 = vmatprep.subr.bf16.mxu0 %v2348_v0 }
 0xafb   :  { %2104 = vmatpush3.bf16.msra.mxu0 %v2507_v35 }
 0xafc   :  { %2117 = vmatprep.subr.bf16.mxu0 %v2348_v0 }
 0xba8   :  { %v941_v32 = vpop.f32.mrf.mxu1 }
 0xbaa   :  { %v2083_v28 = vpop.f32.mrf.mxu1 }
 0xbac   :  { %v944_v36 = vpop.f32.mrf.mxu1 }
 0xbae   :  { %v894_v24 = vpop.f32.mrf.mxu0  ;;  %v2084_v37 = vpop.f32.mrf.mxu1 }
 0xbaf   :  { %v895_v38 = vadd.f32 %v2552_v52, %v894_v24  ;;  %v173_v24 = vadd.f32 %v2463_v9, %v2547_v47 }
 0xbb0   :  { %v2075_v39 = vpop.f32.mrf.mxu0 }
 0xbb1   :  { %v947_v40 = vadd.f32 %v941_v32, %v895_v38 }
 0xbb2   :  { %v897_v41 = vpop.f32.mrf.mxu0 }
 0xbb3   :  { %2264 = vtanh.f32 %v947_v40  ;;  %v1871_v57 = vmul.f32 -1.442695, %v947_v40 }
 0xbb4   :  { %v2076_v43 = vpop.f32.mrf.mxu0 }
 0xbb6   :  { %v1006_v49 = vpop.f32.mrf.mxu0 }
 0xbb7   :  { %v1012_v50 = vadd.f32 %v1006_v49, %v170_v48 }
 0xbb8   :  { %v2091_v51 = vpop.f32.mrf.mxu0 }
 0xbb9   :  { %2266 = vtanh.f32 %v1012_v50  ;;  %v1873_v58 = vmul.f32 -1.442695, %v1012_v50 }
 0xbba   :  { %v1009_v53 = vpop.f32.mrf.mxu0  ;;  %2268 = vpow2.f32 %v1871_v57 }
 0xbbb   :  { %2270 = vpow2.f32 %v1873_v58 }
 0xbbc   :  { %v2092_v54 = vpop.f32.mrf.mxu0 }
 0xbc0   :  { %v2265_v55 = vpop.eup %2264 }
 0xbc1   :  { %957 = vrot.lane.b32.xlu1 %v2265_v55, %s2350_s21 }
 0xbc6   :  { %v2267_v56 = vpop.eup %2266 }
 0xbc7   :  { %1022 = vrot.lane.b32.xlu0 %v2267_v56, %s2350_s21  ;;  %v2269_v59 = vpop.eup %2268 }
 0xbc8   :  { %v951_v60 = vadd.f32 1.0, %v2269_v59  ;;  %v2271_v61 = vpop.eup %2270 }
 0xbc9   :  { %v1016_v45 = vadd.f32 1.0, %v2271_v61 }
 0xbca   :  { %2272 = vrcp.f32 %v951_v60 }
 0xbcb   :  { %2274 = vrcp.f32 %v1016_v45 }
 0xbd7   :  { %v2273_v62 = vpop.eup %2272 }
 0xbd8   :  { %v2275_v3 = vpop.eup %2274  ;;  %v955_v6 = vmul.f32 %v2273_v62, %v2644_v15 }
 0xbd9   :  { %v1020_v10 = vmul.f32 %v2275_v3, %v2648_v18 }
 0xc33   :  { %v958_v63 = vpop.permute.xlu1 %957 }
 0xc34   :  { %v960_v1 = vmul.f32 %v2273_v62, %v958_v63 }
 0xc36   :  { %962 = vrot.lane.b32.xlu1 %v960_v1, %s2350_s21 }
 0xc39   :  { %v1023_v4 = vpop.permute.xlu0 %1022 }
 0xc3a   :  { %v1025_v42 = vmul.f32 %v2275_v3, %v1023_v4 }
 0xc3c   :  { %1027 = vrot.lane.b32.xlu0 %v1025_v42, %s2350_s21 }
 0xca8   :  { %v963_v8 = vpop.permute.xlu1 %962 }
 0xca9   :  { %v2684_v7 = vadd.f32 %v963_v8, %v955_v6 }
 0xcab   :  { %2276 = vtanh.f32 %v2684_v7 }
 0xcae   :  { %v1028_v11 = vpop.permute.xlu0 %1027 }
 0xcaf   :  { %v2688_v12 = vadd.f32 %v1028_v11, %v1020_v10 }
 0xcb1   :  { %2278 = vtanh.f32 %v2688_v12 }
 0xcb8   :  { %v2277_v13 = vpop.eup %2276 }
 0xcb9   :  { %968 = vrot.lane.b32.xlu1 %v2277_v13, %s2350_s21 }
 0xcbe   :  { %v2279_v14 = vpop.eup %2278 }
 0xcbf   :  { %1033 = vrot.lane.b32.xlu0 %v2279_v14, %s2350_s21 }
 0xd2b   :  { %v969_v16 = vpop.permute.xlu1 %968 }
 0xd2c   :  { %v971_v15 = vmul.f32 %v2273_v62, %v969_v16  ;;  %v2746_v16 = vld [vmem:[%s2880_s2 + $0x8] sm:$0xff]  }
 0xd2e   :  { %v1084_v17 = vpack.c.bf16 %v971_v15, %v971_v15 }
 0xd30   :  { %1086 = vrot.lane.b32.xlu1 %v1084_v17, %s2351_s18 }
 0xd31   :  { %v1034_v19 = vpop.permute.xlu0 %1033 }
 0xd32   :  { %v1036_v21 = vmul.f32 %v2275_v3, %v1034_v19 }
 0xd34   :  { %v1037_v22 = vpack.c.bf16 %v1036_v21, %v1036_v21 }
 0xd36   :  { %1039 = vrot.lane.b32.xlu0 %v1037_v22, %s2351_s18 }
 0xda2   :  { %v1087_v18 = vpop.permute.xlu1 %1086 }
 0xda3   :  { %2106 = vmatmul.mubr.msk.bf16.vlgmr.msra.gmra.mxu0 %vm203_vm2, %v1087_v18 }
 0xda4   :  { %2118 = vmatpush3.bf16.msra.mxu0 %v2484_v31  ;;  %2121 = vmatprep.mubr.msk.bf16.mxu0 %vm2349_vm0, %v2348_v0 }
 0xda5   :  { %2119 = vmatprep.subr.bf16.mxu0 %v2348_v0 }
 0xda8   :  { %v1040_v20 = vpop.permute.xlu0 %1039  ;;  %2120 = vmatpush3.bf16.msra.mxu0 %v2500_v34 }
 0xda9   :  { %2098 = vmatmul.mubr.msk.bf16.vlgmr.msra.gmra.mxu1 %vm203_vm2, %v1040_v20  ;;  %2133 = vmatprep.subr.bf16.mxu0 %v2348_v0 }
 0xdaa   :  { %2110 = vmatpush3.bf16.msra.mxu1 %v2432_v2  ;;  %2113 = vmatprep.mubr.msk.bf16.mxu1 %vm2349_vm0, %v2348_v0 }
 0xdab   :  { %2111 = vmatprep.subr.bf16.mxu1 %v2348_v0 }
 0xdae   :  { %2112 = vmatpush3.bf16.msra.mxu1 %v2446_v5 }
 0xdaf   :  { %2125 = vmatprep.subr.bf16.mxu1 %v2348_v0 }
 0xdb1   :  { %2114 = vmatmul.mubr.msk.bf16.vlgmr.msra.gmra.mxu1 %vm203_vm2, %v1040_v20  ;;  %v178_v20 = vadd.f32 %v2541_v44, %v2463_v9 }
 0xdb2   :  { %2126 = vmatpush3.bf16.msra.mxu1 %v2493_v33  ;;  %2129 = vmatprep.mubr.msk.bf16.mxu1 %vm2349_vm0, %v2348_v0 }
 0xdb3   :  { %2127 = vmatprep.subr.bf16.mxu1 %v2348_v0 }
 0xdb6   :  { %2128 = vmatpush3.bf16.msra.mxu1 %v2507_v35 }
 0xdb7   :  { %2141 = vmatprep.subr.bf16.mxu1 %v2348_v0 }
 0xe63   :  { %v1125_v2 = vpop.f32.mrf.mxu0 }
 0xe65   :  { %v2107_v25 = vpop.f32.mrf.mxu0 }
 0xe67   :  { %v1128_v26 = vpop.f32.mrf.mxu0 }
 0xe69   :  { %v1078_v29 = vpop.f32.mrf.mxu1  ;;  %v2108_v27 = vpop.f32.mrf.mxu0 }
 0xe6a   :  { %v1079_v23 = vadd.f32 %v2552_v52, %v1078_v29 }
 0xe6b   :  { %v2099_v30 = vpop.f32.mrf.mxu1 }
 0xe6c   :  { %v1131_v32 = vadd.f32 %v1125_v2, %v1079_v23 }
 0xe6d   :  { %v1081_v28 = vpop.f32.mrf.mxu1 }
 0xe6e   :  { %2280 = vtanh.f32 %v1131_v32  ;;  %v1876_v49 = vmul.f32 -1.442695, %v1131_v32 }
 0xe6f   :  { %v2100_v36 = vpop.f32.mrf.mxu1 }
 0xe71   :  { %v1190_v37 = vpop.f32.mrf.mxu1 }
 0xe72   :  { %v1196_v38 = vadd.f32 %v1190_v37, %v173_v24 }
 0xe73   :  { %v2115_v39 = vpop.f32.mrf.mxu1 }
 0xe74   :  { %2282 = vtanh.f32 %v1196_v38  ;;  %v1878_v50 = vmul.f32 -1.442695, %v1196_v38 }
 0xe75   :  { %v1193_v40 = vpop.f32.mrf.mxu1  ;;  %2284 = vpow2.f32 %v1876_v49 }
 0xe76   :  { %2286 = vpow2.f32 %v1878_v50 }
 0xe77   :  { %v2116_v41 = vpop.f32.mrf.mxu1 }
 0xe7b   :  { %v2281_v43 = vpop.eup %2280 }
 0xe7c   :  { %1141 = vrot.lane.b32.xlu1 %v2281_v43, %s2350_s21 }
 0xe81   :  { %v2283_v48 = vpop.eup %2282 }
 0xe82   :  { %1206 = vrot.lane.b32.xlu0 %v2283_v48, %s2350_s21  ;;  %v2285_v51 = vpop.eup %2284 }
 0xe83   :  { %v1135_v53 = vadd.f32 1.0, %v2285_v51  ;;  %v2287_v54 = vpop.eup %2286 }
 0xe84   :  { %v1200_v47 = vadd.f32 1.0, %v2287_v54 }
 0xe85   :  { %2288 = vrcp.f32 %v1135_v53 }
 0xe86   :  { %2290 = vrcp.f32 %v1200_v47 }
 0xe92   :  { %v2289_v55 = vpop.eup %2288 }
 0xe93   :  { %v2291_v58 = vpop.eup %2290  ;;  %v1139_v61 = vmul.f32 %v2289_v55, %v2684_v7 }
 0xe94   :  { %v1204_v63 = vmul.f32 %v2291_v58, %v2688_v12 }
 0xeee   :  { %v1142_v56 = vpop.permute.xlu1 %1141 }
 0xeef   :  { %v1144_v57 = vmul.f32 %v2289_v55, %v1142_v56 }
 0xef1   :  { %1146 = vrot.lane.b32.xlu1 %v1144_v57, %s2350_s21 }
 0xef4   :  { %v1207_v59 = vpop.permute.xlu0 %1206 }
 0xef5   :  { %v1209_v60 = vmul.f32 %v2291_v58, %v1207_v59 }
 0xef7   :  { %1211 = vrot.lane.b32.xlu0 %v1209_v60, %s2350_s21 }
 0xf63   :  { %v1147_v45 = vpop.permute.xlu1 %1146 }
 0xf64   :  { %v2724_v62 = vadd.f32 %v1147_v45, %v1139_v61  ;;  %v2341_v45 = vld [vmem:[%s2885_s4 + $0x8] sm:$0xff]  }
 0xf66   :  { %2292 = vtanh.f32 %v2724_v62 }
 0xf69   :  { %v1212_v1 = vpop.permute.xlu0 %1211 }
 0xf6a   :  { %v2728_v3 = vadd.f32 %v1212_v1, %v1204_v63  ;;  %v2342_v63 = vld [vmem:[%s2885_s4] sm:$0xff]  }
 0xf6b   :  { %v2343_v1 = vld [vmem:[%s2880_s2] sm:$0xff]  }
 0xf6c   :  { %2294 = vtanh.f32 %v2728_v3 }
 0xf73   :  { %v2293_v4 = vpop.eup %2292 }
 0xf74   :  { %1152 = vrot.lane.b32.xlu1 %v2293_v4, %s2350_s21  ;;  %v2345_v4 = vld [vmem:[%s2886_s5] sm:$0xff]  }
 0xf79   :  { %v2295_v42 = vpop.eup %2294 }
 0xf7a   :  { %1217 = vrot.lane.b32.xlu0 %v2295_v42, %s2350_s21 }
 0xfe6   :  { %v1153_v6 = vpop.permute.xlu1 %1152 }
 0xfe7   :  { %v1155_v8 = vmul.f32 %v2289_v55, %v1153_v6 }
 0xfe9   :  { %v1268_v7 = vpack.c.bf16 %v1155_v8, %v1155_v8 }
 0xfeb   :  { %1270 = vrot.lane.b32.xlu1 %v1268_v7, %s2351_s18 }
 0xfec   :  { %v1218_v10 = vpop.permute.xlu0 %1217 }
 0xfed   :  { %v1220_v11 = vmul.f32 %v2291_v58, %v1218_v10 }
 0xfef   :  { %v1221_v13 = vpack.c.bf16 %v1220_v11, %v1220_v11 }
 0xff1   :  { %1223 = vrot.lane.b32.xlu0 %v1221_v13, %s2351_s18 }
0x105d   :  { %v1271_v12 = vpop.permute.xlu1 %1270 }
0x105e   :  { %2130 = vmatmul.mubr.msk.bf16.vlgmr.msra.gmra.mxu1 %vm203_vm2, %v1271_v12 }
0x105f   :  { %2142 = vmatpush3.bf16.msra.mxu1 %v2484_v31  ;;  %2145 = vmatprep.mubr.msk.bf16.mxu1 %vm2349_vm0, %v2348_v0 }
0x1060   :  { %2143 = vmatprep.subr.bf16.mxu1 %v2348_v0 }
0x1063   :  { %v1224_v14 = vpop.permute.xlu0 %1223  ;;  %2144 = vmatpush3.bf16.msra.mxu1 %v2500_v34 }
0x1064   :  { %2122 = vmatmul.mubr.msk.bf16.vlgmr.msra.gmra.mxu0 %vm203_vm2, %v1224_v14  ;;  %2157 = vmatprep.subr.bf16.mxu1 %v2348_v0 }
0x1065   :  { %2134 = vmatpush3.bf16.msra.mxu0 %v2746_v16  ;;  %2137 = vmatprep.mubr.msk.bf16.mxu0 %vm2349_vm0, %v2348_v0 }
0x1066   :  { %2135 = vmatprep.subr.bf16.mxu0 %v2348_v0 }
0x1069   :  { %2136 = vmatpush3.bf16.msra.mxu0 %v2446_v5 }
0x106a   :  { %2149 = vmatprep.subr.bf16.mxu0 %v2348_v0 }
0x106c   :  { %2138 = vmatmul.mubr.msk.bf16.vlgmr.msra.gmra.mxu0 %vm203_vm2, %v1224_v14 }
0x106d   :  { %2150 = vmatpush3.bf16.msra.mxu0 %v2493_v33  ;;  %2153 = vmatprep.mubr.msk.bf16.mxu0 %vm2349_vm0, %v2348_v0 }
0x106e   :  { %2151 = vmatprep.subr.bf16.mxu0 %v2348_v0 }
0x1071   :  { %2152 = vmatpush3.bf16.msra.mxu0 %v2507_v35 }
0x1072   :  { %2165 = vmatprep.subr.bf16.mxu0 %v2348_v0 }
0x111e   :  { %v1309_v31 = vpop.f32.mrf.mxu1 }
0x1120   :  { %v2131_v34 = vpop.f32.mrf.mxu1 }
0x1122   :  { %v1312_v15 = vpop.f32.mrf.mxu1 }
0x1124   :  { %v1262_v17 = vpop.f32.mrf.mxu0  ;;  %v2132_v5 = vpop.f32.mrf.mxu1 }
0x1125   :  { %v1263_v19 = vadd.f32 %v2552_v52, %v1262_v17 }
0x1126   :  { %v2123_v21 = vpop.f32.mrf.mxu0 }
0x1127   :  { %v1315_v22 = vadd.f32 %v1309_v31, %v1263_v19  ;;  %v2346_v31 = vld [vmem:[%s2883_s3] ss:$0 sm:$0xff] }
0x1128   :  { %v1265_v18 = vpop.f32.mrf.mxu0  ;;  %v181_v34 = vadd.f32 %v2346_v31, %v2545_v46  ;;  %v19_v31 = vstv %s2889_s10 }
0x1129   :  { %2296 = vtanh.f32 %v1315_v22  ;;  %v1881_v30 = vmul.f32 -1.442695, %v1315_v22  ;;  %20 = vst [vmem:[#allocation2] sm:$0x1] %v19_v31 }
0x112a   :  { %v2124_v33 = vpop.f32.mrf.mxu0 }
0x112c   :  { %v1374_v2 = vpop.f32.mrf.mxu0 }
0x112d   :  { %v1380_v25 = vadd.f32 %v1374_v2, %v178_v20 }
0x112e   :  { %v2139_v35 = vpop.f32.mrf.mxu0 }
0x112f   :  { %2298 = vtanh.f32 %v1380_v25  ;;  %v1883_v32 = vmul.f32 -1.442695, %v1380_v25 }
0x1130   :  { %v1377_v26 = vpop.f32.mrf.mxu0  ;;  %2300 = vpow2.f32 %v1881_v30 }
0x1131   :  { %2302 = vpow2.f32 %v1883_v32 }
0x1132   :  { %v2140_v29 = vpop.f32.mrf.mxu0 }
0x1136   :  { %v2297_v27 = vpop.eup %2296 }
0x1137   :  { %1325 = vrot.lane.b32.xlu1 %v2297_v27, %s2350_s21 }
0x113c   :  { %v2299_v23 = vpop.eup %2298 }
0x113d   :  { %1390 = vrot.lane.b32.xlu0 %v2299_v23, %s2350_s21  ;;  %v2301_v28 = vpop.eup %2300 }
0x113e   :  { %v1319_v36 = vadd.f32 1.0, %v2301_v28  ;;  %v2303_v24 = vpop.eup %2302 }
0x113f   :  { %v1384_v9 = vadd.f32 1.0, %v2303_v24 }
0x1140   :  { %2304 = vrcp.f32 %v1319_v36 }
0x1141   :  { %2306 = vrcp.f32 %v1384_v9 }
0x114d   :  { %v2305_v44 = vpop.eup %2304 }
0x114e   :  { %v2307_v39 = vpop.eup %2306  ;;  %v1323_v43 = vmul.f32 %v2305_v44, %v2724_v62 }
0x114f   :  { %v1388_v50 = vmul.f32 %v2307_v39, %v2728_v3  ;;  %v2344_v3 = vld [vmem:[%s2886_s5 + $0x8] sm:$0xff]  }
0x11a9   :  { %v1326_v37 = vpop.permute.xlu1 %1325 }
0x11aa   :  { %v1328_v38 = vmul.f32 %v2305_v44, %v1326_v37 }
0x11ac   :  { %1330 = vrot.lane.b32.xlu1 %v1328_v38, %s2350_s21 }
0x11af   :  { %v1391_v40 = vpop.permute.xlu0 %1390 }
0x11b0   :  { %v1393_v41 = vmul.f32 %v2307_v39, %v1391_v40 }
0x11b2   :  { %1395 = vrot.lane.b32.xlu0 %v1393_v41, %s2350_s21 }
0x121e   :  { %v1331_v48 = vpop.permute.xlu1 %1330 }
0x121f   :  { %v2769_v49 = vadd.f32 %v1331_v48, %v1323_v43 }
0x1221   :  { %2308 = vtanh.f32 %v2769_v49 }
0x1224   :  { %v1396_v51 = vpop.permute.xlu0 %1395 }
0x1225   :  { %v2773_v53 = vadd.f32 %v1396_v51, %v1388_v50 }
0x1227   :  { %2310 = vtanh.f32 %v2773_v53 }
0x122e   :  { %v2309_v54 = vpop.eup %2308 }
0x122f   :  { %1336 = vrot.lane.b32.xlu1 %v2309_v54, %s2350_s21 }
0x1234   :  { %v2311_v47 = vpop.eup %2310 }
0x1235   :  { %1401 = vrot.lane.b32.xlu0 %v2311_v47, %s2350_s21 }
0x12a1   :  { %v1337_v55 = vpop.permute.xlu1 %1336 }
0x12a2   :  { %v1339_v56 = vmul.f32 %v2305_v44, %v1337_v55 }
0x12a4   :  { %v1452_v57 = vpack.c.bf16 %v1339_v56, %v1339_v56 }
0x12a6   :  { %1454 = vrot.lane.b32.xlu1 %v1452_v57, %s2351_s18  ;;  %v2347_v57 = vld [vmem:[%s2887_s6] ss:$0 sm:$0xff] }
0x12a7   :  { %v1402_v58 = vpop.permute.xlu0 %1401 }
0x12a8   :  { %v1404_v59 = vmul.f32 %v2307_v39, %v1402_v58 }
0x12aa   :  { %v1405_v60 = vpack.c.bf16 %v1404_v59, %v1404_v59 }
0x12ac   :  { %1407 = vrot.lane.b32.xlu0 %v1405_v60, %s2351_s18 }
0x1318   :  { %v1455_v61 = vpop.permute.xlu1 %1454 }
0x1319   :  { %2154 = vmatmul.mubr.msk.bf16.vlgmr.msra.gmra.mxu0 %vm203_vm2, %v1455_v61 }
0x131a   :  { %2166 = vmatpush3.bf16.msra.mxu0 %v2341_v45  ;;  %2169 = vmatprep.mubr.msk.bf16.mxu0 %vm2349_vm0, %v2348_v0 }
0x131b   :  { %2167 = vmatprep.subr.bf16.mxu0 %v2348_v0 }
0x131e   :  { %v1408_v62 = vpop.permute.xlu0 %1407  ;;  %2168 = vmatpush3.bf16.msra.mxu0 %v2342_v63 }
0x131f   :  { %2146 = vmatmul.mubr.msk.bf16.vlgmr.msra.gmra.mxu1 %vm203_vm2, %v1408_v62  ;;  %2181 = vmatprep.subr.mxu0 %v2348_v0 }
0x1320   :  { %2158 = vmatpush3.bf16.msra.mxu1 %v2746_v16  ;;  %2161 = vmatprep.mubr.msk.bf16.mxu1 %vm2349_vm0, %v2348_v0 }
0x1321   :  { %2159 = vmatprep.subr.bf16.mxu1 %v2348_v0 }
0x1324   :  { %2160 = vmatpush3.bf16.msra.mxu1 %v2343_v1 }
0x1325   :  { %2173 = vmatprep.subr.bf16.mxu1 %v2348_v0 }
0x1327   :  { %2162 = vmatmul.mubr.msk.bf16.vlgmr.msra.gmra.mxu1 %vm203_vm2, %v1408_v62 }
0x1328   :  { %2174 = vmatpush3.bf16.msra.mxu1 %v2344_v3  ;;  %2177 = vmatprep.mubr.msk.bf16.mxu1 %vm2349_vm0, %v2348_v0 }
0x1329   :  { %2175 = vmatprep.subr.bf16.mxu1 %v2348_v0 }
0x132c   :  { %2176 = vmatpush3.bf16.msra.mxu1 %v2345_v4 }
0x13d9   :  { %v1493_v42 = vpop.f32.mrf.mxu0 }
0x13db   :  { %v2155_v6 = vpop.f32.mrf.mxu0 }
0x13dd   :  { %v1496_v8 = vpop.f32.mrf.mxu0 }
0x13df   :  { %v1446_v7 = vpop.f32.mrf.mxu1  ;;  %v2156_v10 = vpop.f32.mrf.mxu0 }
0x13e0   :  { %v1447_v11 = vadd.f32 %v2552_v52, %v1446_v7 }
0x13e1   :  { %v2147_v13 = vpop.f32.mrf.mxu1 }
0x13e2   :  { %v1499_v12 = vadd.f32 %v1493_v42, %v1447_v11  ;;  %v1733_v11 = vld [vmem:[%s2888_s9 + $0x18] sm:$0xff]  ;;  %v1732_v13 = vld [vmem:[%s2888_s9 + $0x10] sm:$0xff] }
0x13e3   :  { %v1449_v14 = vpop.f32.mrf.mxu1 }
0x13e4   :  { %2312 = vtanh.f32 %v1499_v12  ;;  %v1886_v18 = vmul.f32 -1.442695, %v1499_v12  ;;  %v1731_v12 = vld [vmem:[%s2888_s9 + $0x8] sm:$0xff] }
0x13e5   :  { %v2148_v16 = vpop.f32.mrf.mxu1 }
0x13e6   :  { %v1730_v16 = vld [vmem:[%s2888_s9] sm:$0xff] }
0x13e7   :  { %v1558_v15 = vpop.f32.mrf.mxu1 }
0x13e8   :  { %v1564_v17 = vadd.f32 %v1558_v15, %v181_v34 }
0x13e9   :  { %v2163_v5 = vpop.f32.mrf.mxu1 }
0x13ea   :  { %2314 = vtanh.f32 %v1564_v17  ;;  %v1888_v33 = vmul.f32 -1.442695, %v1564_v17 }
0x13eb   :  { %v1561_v19 = vpop.f32.mrf.mxu1  ;;  %2316 = vpow2.f32 %v1886_v18 }
0x13ec   :  { %2318 = vpow2.f32 %v1888_v33 }
0x13ed   :  { %v2164_v21 = vpop.f32.mrf.mxu1 }
0x13ee   :  { %v1894_v21 = vld [vmem:[#allocation2] ss:$0 sm:$0xff] }
0x13f1   :  { %v2313_v22 = vpop.eup %2312 }
0x13f2   :  { %1509 = vrot.lane.b32.xlu1 %v2313_v22, %s2350_s21 }
0x13f7   :  { %v2315_v52 = vpop.eup %2314 }
0x13f8   :  { %1574 = vrot.lane.b32.xlu0 %v2315_v52, %s2350_s21  ;;  %v2317_v20 = vpop.eup %2316 }
0x13f9   :  { %v1503_v2 = vadd.f32 1.0, %v2317_v20  ;;  %v2319_v25 = vpop.eup %2318 }
0x13fa   :  { %v1568_v46 = vadd.f32 1.0, %v2319_v25 }
0x13fb   :  { %2320 = vrcp.f32 %v1503_v2 }
0x13fc   :  { %2322 = vrcp.f32 %v1568_v46 }
0x1408   :  { %v2321_v35 = vpop.eup %2320 }
0x1409   :  { %v2323_v27 = vpop.eup %2322  ;;  %v1507_v32 = vmul.f32 %v2321_v35, %v2769_v49 }
0x140a   :  { %v1572_v24 = vmul.f32 %v2323_v27, %v2773_v53 }
0x1464   :  { %v1510_v26 = vpop.permute.xlu1 %1509 }
0x1465   :  { %v1512_v29 = vmul.f32 %v2321_v35, %v1510_v26 }
0x1467   :  { %1514 = vrot.lane.b32.xlu1 %v1512_v29, %s2350_s21 }
0x146a   :  { %v1575_v23 = vpop.permute.xlu0 %1574 }
0x146b   :  { %v1577_v30 = vmul.f32 %v2323_v27, %v1575_v23 }
0x146d   :  { %1579 = vrot.lane.b32.xlu0 %v1577_v30, %s2350_s21 }
0x14d9   :  { %v1515_v28 = vpop.permute.xlu1 %1514 }
0x14da   :  { %v1517_v36 = vadd.f32 %v1515_v28, %v1507_v32 }
0x14dc   :  { %2324 = vtanh.f32 %v1517_v36 }
0x14df   :  { %v1580_v9 = vpop.permute.xlu0 %1579 }
0x14e0   :  { %v2821_v44 = vadd.f32 %v1580_v9, %v1572_v24 }
0x14e2   :  { %2326 = vtanh.f32 %v2821_v44 }
0x14e9   :  { %v2325_v37 = vpop.eup %2324 }
0x14ea   :  { %1520 = vrot.lane.b32.xlu1 %v2325_v37, %s2350_s21 }
0x14ef   :  { %v2327_v38 = vpop.eup %2326 }
0x14f0   :  { %1585 = vrot.lane.b32.xlu0 %v2327_v38, %s2350_s21 }
0x155c   :  { %v1521_v39 = vpop.permute.xlu1 %1520 }
0x155d   :  { %v1523_v40 = vmul.f32 %v2321_v35, %v1521_v39 }
0x155f   :  { %v1636_v41 = vpack.c.bf16 %v1523_v40, %v1523_v40 }
0x1561   :  { %1638 = vrot.lane.b32.xlu1 %v1636_v41, %s2351_s18 }
0x1562   :  { %v1586_v43 = vpop.permute.xlu0 %1585 }
0x1563   :  { %v1588_v48 = vmul.f32 %v2323_v27, %v1586_v43 }
0x1565   :  { %v1589_v49 = vpack.c.bf16 %v1588_v48, %v1588_v48 }
0x1567   :  { %1591 = vrot.lane.b32.xlu0 %v1589_v49, %s2351_s18 }
0x15d3   :  { %v1639_v50 = vpop.permute.xlu1 %1638 }
0x15d4   :  { %2178 = vmatmul.mubr.msk.bf16.vlgmr.msra.gmra.mxu1 %vm203_vm2, %v1639_v50 }
0x15d9   :  { %v1592_v51 = vpop.permute.xlu0 %1591 }
0x15da   :  { %2170 = vmatmul.mubr.msk.bf16.vlgmr.msra.gmra.mxu0 %vm203_vm2, %v1592_v51 }
0x15db   :  { %2189 = vmatprep.mubr.msk.f32.mxu0 %vm2349_vm0, %v2348_v0  ;;  %2182 = vmatpush3.msra.mxu0 %v1733_v11 }
0x15dc   :  { %2183 = vmatprep.subr.mxu0 %v2348_v0 }
0x15dd   :  { %2184 = vmatpush3.msra.mxu0 %v1732_v13 }
0x15de   :  { %2185 = vmatprep.subr.mxu0 %v2348_v0 }
0x15df   :  { %2186 = vmatpush3.msra.mxu0 %v1731_v12 }
0x15e0   :  { %2187 = vmatprep.subr.mxu0 %v2348_v0 }
0x15e1   :  { %2188 = vmatpush3.msra.mxu0 %v1730_v16 }
0x1694   :  { %v1677_v53 = vpop.f32.mrf.mxu1 }
0x1696   :  { %v2179_v54 = vpop.f32.mrf.mxu1 }
0x1698   :  { %v1680_v47 = vpop.f32.mrf.mxu1 }
0x169a   :  { %v1630_v55 = vpop.f32.mrf.mxu0  ;;  %v2180_v56 = vpop.f32.mrf.mxu1 }
0x169b   :  { %v1631_v58 = vadd.f32 %v2347_v57, %v1630_v55 }
0x169c   :  { %v2171_v59 = vpop.f32.mrf.mxu0 }
0x169d   :  { %v1683_v60 = vadd.f32 %v1677_v53, %v1631_v58 }
0x169e   :  { %v1633_v61 = vpop.f32.mrf.mxu0 }
0x169f   :  { %2328 = vtanh.f32 %v1683_v60  ;;  %v1891_v63 = vmul.f32 -1.442695, %v1683_v60 }
0x16a0   :  { %v2172_v45 = vpop.f32.mrf.mxu0 }
0x16a1   :  { %2330 = vpow2.f32 %v1891_v63 }
0x16ac   :  { %v2329_v62 = vpop.eup %2328 }
0x16ad   :  { %1693 = vrot.lane.b32.xlu0 %v2329_v62, %s2350_s21 }
0x16ae   :  { %v2331_v1 = vpop.eup %2330 }
0x16af   :  { %v1687_v3 = vadd.f32 1.0, %v2331_v1 }
0x16b1   :  { %2332 = vrcp.f32 %v1687_v3 }
0x16be   :  { %v2333_v4 = vpop.eup %2332 }
0x16bf   :  { %v1691_v8 = vmul.f32 %v2333_v4, %v1517_v36 }
0x171f   :  { %v1694_v42 = vpop.permute.xlu0 %1693 }
0x1720   :  { %v1696_v6 = vmul.f32 %v2333_v4, %v1694_v42 }
0x1722   :  { %1698 = vrot.lane.b32.xlu1 %v1696_v6, %s2350_s21 }
0x1794   :  { %v1699_v7 = vpop.permute.xlu1 %1698 }
0x1795   :  { %v1701_v10 = vadd.f32 %v1699_v7, %v1691_v8 }
0x1797   :  { %2334 = vtanh.f32 %v1701_v10 }
0x17a4   :  { %v2335_v14 = vpop.eup %2334 }
0x17a5   :  { %1704 = vrot.lane.b32.xlu0 %v2335_v14, %s2350_s21 }
0x17a9   :  { %1709 = vrot.lane.b32.xlu0 %v1588_v48, %s2351_s18 }
0x17ad   :  { %1725 = vrot.lane.b32.xlu0 %v1701_v10, %s2352_s8 }
0x1817   :  { %v1705_v34 = vpop.permute.xlu0 %1704 }
0x1818   :  { %v1707_v15 = vmul.f32 %v2333_v4, %v1705_v34 }
0x181a   :  { %1719 = vrot.lane.b32.xlu1 %v1707_v15, %s2351_s18 }
0x181b   :  { %v1710_v17 = vpop.permute.xlu0 %1709 }
0x181c   :  { %1712 = vst.msk [vmem:[%s2890_s12] sm:$0xff] %vm203_vm2, %v1710_v17 }
0x181e   :  { %1714 = vrot.lane.b32.xlu1 %v2821_v44, %s2352_s8 }
0x181f   :  { %v1726_v0 = vpop.permute.xlu0 %1725 }
0x1820   :  { %1893 = vst.msk [vmem:[%s2891_s13 + $0x8] sm:$0xff] %vm203_vm2, %v1726_v0 }
0x188c   :  { %v1720_v5 = vpop.permute.xlu1 %1719 }
0x188d   :  { %1892 = vst.msk [vmem:[%s2890_s12 + $0x8] sm:$0xff] %vm203_vm2, %v1720_v5  ;;  %2190 = vmatmul.mubr.msk.f32.vlgmr.msra.gmra.mxu0 %vm203_vm2, %v1720_v5 }
0x1890   :  { %v1715_v19 = vpop.permute.xlu1 %1714 }
0x1891   :  { %1717 = vst.msk [vmem:[%s2891_s13] sm:$0xff] %vm203_vm2, %v1715_v19 }
0x194d   :  { %v1809_v22 = vpop.f32.mrf.mxu0 }
0x194e   :  { %v1810_v52 = vadd.f32 %v1894_v21, %v1809_v22 }
0x194f   :  { %v2191_v18 = vpop.f32.mrf.mxu0 }
0x1950   :  { %v1896_v33 = vmul.f32 -1.442695, %v1810_v52 }
0x1952   :  { %2336 = vpow2.f32 %v1896_v33 }
0x195f   :  { %v2337_v20 = vpop.eup %2336 }
0x1960   :  { %v1816_v2 = vadd.f32 1.0, %v2337_v20 }
0x1962   :  { %2338 = vrcp.f32 %v1816_v2 }
0x196f   :  { %v2339_v25 = vpop.eup %2338 }
0x1970   :  { %1820 = vst.msk [vmem:[%s2892_s11] sm:$0xff] %vm1819_vm3, %v2339_v25 }

</bundles_post_ra>
